<compile_context>
chip_gen: v7x
topology: tpu7x:2x2x1
jax: 0.10.0
libtpu: 0.0.40
codegen_flags: <defaults>
</compile_context>

<pallas_src>
import functools

import jax
import jax.numpy as jnp
import numpy as np
from jax.experimental import pallas as pl
from jax.experimental.pallas import tpu as pltpu

_LN_EPS = 1e-5


def _round_up(v, m):
    return (v + m - 1) // m * m


# ------------------------------------------------------------------ Pallas kernel
def _patch_embed_kernel(x_ref, w_ref, b_ref, g_ref, be_ref, o_ref, *, e_real, use_norm):
    """Fused patch projection (+ optional LayerNorm) for one row-tile of tokens.

    x_ref : (TR, Kpad)     bf16   im2col'd patches (zero tail-padded in K)
    w_ref : (Kpad, Epad)   bf16   Conv3d weight as a matmul operand (zero-padded)
    b_ref : (1, Epad)      f32    Conv3d bias (zero-padded)
    g_ref : (1, Epad)      f32    LayerNorm gamma (zero-padded; unused if use_norm=False)
    be_ref: (1, Epad)      f32    LayerNorm beta  (zero-padded; unused if use_norm=False)
    o_ref : (TR, Epad)     bf16
    """
    # bf16 x bf16 -> f32 accumulation on the MXU.
    y = jnp.dot(x_ref[...], w_ref[...], preferred_element_type=jnp.float32) + b_ref[...]

    if use_norm:
        e_pad = o_ref.shape[-1]
        inv_e = np.float32(1.0 / e_real)
        # Padded embed lanes are exactly zero (zero weight columns + zero bias), so the sum
        # over Epad lanes equals the sum over the real E lanes.
        mu = jnp.sum(y, axis=-1, keepdims=True) * inv_e
        cen = y - mu
        if e_real != e_pad:
            col = jax.lax.broadcasted_iota(jnp.int32, y.shape, y.ndim - 1)
            cen = jnp.where(col < e_real, cen, 0.0)       # keep padded lanes out of the variance
        var = jnp.sum(cen * cen, axis=-1, keepdims=True) * inv_e
        y = cen * jax.lax.rsqrt(var + _LN_EPS) * g_ref[...] + be_ref[...]

    o_ref[...] = y.astype(o_ref.dtype)                    # bf16 writeback (HBM-bound kernel)


# ------------------------------------------------------------------ wrapper
def patch_embed_3d(x, weight, bias, gamma=None, beta=None,
                   patch_size=(2, 4, 4), use_norm=True, channels_last=False):
    """PatchEmbed3D forward.

    x      : (B, C, D, H, W)  float32            (PyTorch NCDHW layout)
    weight : (E, C, pd, ph, pw)  Conv3d weight
    bias   : (E,)                Conv3d bias
    gamma, beta : (E,)           LayerNorm params (only used when use_norm=True)
    returns: (B, E, D', H', W')  bf16   (or (B, D', H', W', E) if channels_last=True)

    Output is bf16 (emulates the torch.autocast(bfloat16) usage of this backbone).
    """
    B, C, D, H, W = x.shape
    pd, ph, pw = patch_size
    E = weight.shape[0]

    # Spatial right-padding to multiples of the patch size (mirrors the three F.pad calls).
    Dp, Hp, Wp = _round_up(D, pd), _round_up(H, ph), _round_up(W, pw)
    Do, Ho, Wo = Dp // pd, Hp // ph, Wp // pw

    # --- glue pass 1 (the only heavy one): bf16 cast + single patch-major transpose -------------
    xb = x.astype(jnp.bfloat16)                           # cast first -> half the glue traffic
    if (Dp, Hp, Wp) != (D, H, W):
        xb = jnp.pad(xb, ((0, 0), (0, 0), (0, Dp - D), (0, Hp - H), (0, Wp - W)))
    patches = xb.reshape(B, C, Do, pd, Ho, ph, Wo, pw)
    patches = patches.transpose(0, 2, 4, 6, 3, 5, 7, 1)   # (B, Do, Ho, Wo, pd, ph, pw, C)
    K_real = pd * ph * pw * C
    M = B * Do * Ho * Wo
    patches = patches.reshape(M, K_real)

    # Lane-dense dims: tail-pad K and E to multiples of 128 (zero columns / zero weight rows).
    Kpad = _round_up(K_real, 128)
    Epad = _round_up(E, 128)

    # Adaptive row tile: even grid >= 2 (both v7x TCs busy), TR multiple of 8, tiny M padding.
    M8 = _round_up(M, 8)
    TR_CAP = 1024
    grid = max(-(-M8 // TR_CAP), 2)
    if grid % 2:
        grid += 1
    TR = _round_up(-(-M8 // grid), 8)
    Mpad = grid * TR

    if (Mpad, Kpad) != (M, K_real):
        patches = jnp.pad(patches, ((0, Mpad - M), (0, Kpad - K_real)))

    # Conv3d weight (E, C, pd, ph, pw) -> matmul operand (Kpad, Epad) in matching (pd,ph,pw,C) order.
    wk = jnp.transpose(weight, (2, 3, 4, 1, 0)).reshape(K_real, E)
    wk = jnp.pad(wk, ((0, Kpad - K_real), (0, Epad - E))).astype(jnp.bfloat16)
    bk = jnp.pad(bias.astype(jnp.float32), (0, Epad - E)).reshape(1, Epad)
    if use_norm:
        gk = jnp.pad(gamma.astype(jnp.float32), (0, Epad - E)).reshape(1, Epad)
        bek = jnp.pad(beta.astype(jnp.float32), (0, Epad - E)).reshape(1, Epad)
    else:
        gk = jnp.zeros((1, Epad), jnp.float32)
        bek = jnp.zeros((1, Epad), jnp.float32)

    kern = functools.partial(_patch_embed_kernel, e_real=E, use_norm=use_norm)
    # Working set per step (TR=1024: ~0.5 MiB in + 0.25 MiB out, double-buffered) is far under the
    # scoped-VMEM default on every generation; default 2-deep buffering is enough here.
    out = pl.pallas_call(
        kern,
        out_shape=jax.ShapeDtypeStruct((Mpad, Epad), jnp.bfloat16),
        grid=(grid,),
        in_specs=[pl.BlockSpec((TR, Kpad), lambda i: (i, 0)),        # patch tile
                  pl.BlockSpec((Kpad, Epad), lambda i: (0, 0)),      # weight (resident)
                  pl.BlockSpec((1, Epad), lambda i: (0, 0)),         # bias
                  pl.BlockSpec((1, Epad), lambda i: (0, 0)),         # LN gamma
                  pl.BlockSpec((1, Epad), lambda i: (0, 0))],        # LN beta
        out_specs=pl.BlockSpec((TR, Epad), lambda i: (i, 0)),
        compiler_params=pltpu.CompilerParams(dimension_semantics=("parallel",)),
    )(patches, wk, bk, gk, bek)

    out = out[:M, :E].reshape(B, Do, Ho, Wo, E)            # channel-last token grid (bf16)
    if channels_last:
        return out
    return jnp.transpose(out, (0, 4, 1, 2, 3))             # module layout (B, E, D', H', W')


# ------------------------------------------------------------------ main
if __name__ == "__main__":
    # PatchEmbed3D(patch_size=(2,4,4), in_chans=3, embed_dim=96, norm_layer=nn.LayerNorm)
    patch_size = (2, 4, 4)
    in_chans, embed_dim = 3, 96
    B, D, H, W = 2, 9, 30, 30                  # non-divisible dims exercise the F.pad branches

    key = jax.random.PRNGKey(0)
    kx, kw, kb = jax.random.split(key, 3)
    x = jax.random.normal(kx, (B, in_chans, D, H, W), jnp.float32)
    weight = 0.05 * jax.random.normal(kw, (embed_dim, in_chans) + patch_size, jnp.float32)
    bias = 0.02 * jax.random.normal(kb, (embed_dim,), jnp.float32)
    gamma = jnp.ones((embed_dim,), jnp.float32)   # LayerNorm default init
    beta = jnp.zeros((embed_dim,), jnp.float32)

    pd, ph, pw = patch_size
    Do, Ho, Wo = -(-D // pd), -(-H // ph), -(-W // pw)

    # norm_layer=LayerNorm path (fused in-kernel), module-parity NCDHW output
    y = patch_embed_3d(x, weight, bias, gamma, beta, patch_size=patch_size, use_norm=True)
    y = jax.block_until_ready(y)
    assert y.shape == (B, embed_dim, Do, Ho, Wo), y.shape
    assert y.dtype == jnp.bfloat16
    assert bool(jnp.all(jnp.isfinite(y.astype(jnp.float32))))

    # norm_layer=None path (module default)
    y0 = patch_embed_3d(x, weight, bias, patch_size=patch_size, use_norm=False)
    y0 = jax.block_until_ready(y0)
    assert y0.shape == (B, embed_dim, Do, Ho, Wo), y0.shape

    # channels-last path (perf-review option): must match the NCDHW result exactly
    y_cl = patch_embed_3d(x, weight, bias, gamma, beta, patch_size=patch_size,
                          use_norm=True, channels_last=True)
    y_cl = jax.block_until_ready(y_cl)
    assert y_cl.shape == (B, Do, Ho, Wo, embed_dim), y_cl.shape
    assert bool(jnp.all(jnp.transpose(y_cl, (0, 4, 1, 2, 3)) == y))

    # ------------------------------------------------------------- reference check (f32 XLA conv)
    # bf16 MXU operands + bf16 output emulate autocast(bfloat16); compare with loose tolerances.
    xp = jnp.pad(x, ((0, 0), (0, 0), (0, Do * pd - D), (0, Ho * ph - H), (0, Wo * pw - W)))
    ref = jax.lax.conv_general_dilated(
        xp, weight, window_strides=patch_size, padding="VALID",
        dimension_numbers=("NCDHW", "OIDHW", "NCDHW"))
    ref = ref + bias[None, :, None, None, None]
    err0 = float(jnp.max(jnp.abs(y0.astype(jnp.float32) - ref)))
    assert err0 < 5e-2, err0

    t = jnp.transpose(ref, (0, 2, 3, 4, 1))
    mu = jnp.mean(t, -1, keepdims=True)
    var = jnp.mean((t - mu) ** 2, -1, keepdims=True)
    t = (t - mu) * jax.lax.rsqrt(var + _LN_EPS) * gamma + beta
    refn = jnp.transpose(t, (0, 4, 1, 2, 3))
    err1 = float(jnp.max(jnp.abs(y.astype(jnp.float32) - refn)))
    assert err1 < 1e-1, err1

    print("KERNEL_OK")
</pallas_src>

<mosaic_0001>
module attributes {stable_mosaic.version = 11 : i64} {
  func.func @_patch_embed_kernel(%arg0: i32, %arg1: memref<320x128xbf16, #tpu.memory_space<vmem>>, %arg2: memref<128x128xbf16, #tpu.memory_space<vmem>>, %arg3: memref<1x128xf32, #tpu.memory_space<vmem>>, %arg4: memref<1x128xf32, #tpu.memory_space<vmem>>, %arg5: memref<1x128xf32, #tpu.memory_space<vmem>>, %arg6: memref<320x128xbf16, #tpu.memory_space<vmem>>) attributes {dimension_semantics = [#tpu.dimension_semantics<parallel>], iteration_bounds = array<i64: 2>, scalar_prefetch = 0 : i64, scratch_operands = 0 : i64, tpu.core_type = #tpu.core_type<tc>, window_params = [{transform_indices = @transform_0, window_bounds = array<i64: 320, 128>}, {pipeline_mode = #tpu.pipeline_mode<synchronous>, transform_indices = @transform_1, window_bounds = array<i64: 128, 128>}, {pipeline_mode = #tpu.pipeline_mode<synchronous>, transform_indices = @transform_2, window_bounds = array<i64: 1, 128>}, {pipeline_mode = #tpu.pipeline_mode<synchronous>, transform_indices = @transform_3, window_bounds = array<i64: 1, 128>}, {pipeline_mode = #tpu.pipeline_mode<synchronous>, transform_indices = @transform_4, window_bounds = array<i64: 1, 128>}, {transform_indices = @transform_5, window_bounds = array<i64: 320, 128>}]} {
    %c0 = arith.constant 0 : index
    %c0_0 = arith.constant 0 : index
    %0 = vector.load %arg1[%c0, %c0_0] : memref<320x128xbf16, #tpu.memory_space<vmem>>, vector<320x128xbf16>
    %c0_1 = arith.constant 0 : index
    %c0_2 = arith.constant 0 : index
    %1 = vector.load %arg2[%c0_1, %c0_2] : memref<128x128xbf16, #tpu.memory_space<vmem>>, vector<128x128xbf16>
    %cst = arith.constant dense<0.000000e+00> : vector<320x128xf32>
    %2 = tpu.matmul %0, %1, %cst {dimension_numbers = #tpu.dot_dimension_numbers<[1], [0], [0], [1], [0, 0, 1, 1], [], []>} : vector<320x128xbf16>, vector<128x128xbf16>, vector<320x128xf32> -> vector<320x128xf32>
    %c0_3 = arith.constant 0 : index
    %c0_4 = arith.constant 0 : index
    %3 = vector.load %arg3[%c0_3, %c0_4] : memref<1x128xf32, #tpu.memory_space<vmem>>, vector<1x128xf32>
    %4 = vector.broadcast %3 : vector<1x128xf32> to vector<320x128xf32>
    %5 = arith.addf %2, %4 : vector<320x128xf32>
    %cst_5 = arith.constant dense<0.000000e+00> : vector<320xf32>
    %6 = vector.multi_reduction <add>, %5, %cst_5 [1] : vector<320x128xf32> to vector<320xf32>
    %7 = vector.shape_cast %6 : vector<320xf32> to vector<320x1xf32>
    %cst_6 = arith.constant 0.010416667 : f32
    %8 = vector.broadcast %cst_6 : f32 to vector<320x1xf32>
    %9 = arith.mulf %7, %8 : vector<320x1xf32>
    %10 = vector.broadcast %9 : vector<320x1xf32> to vector<320x128xf32>
    %11 = arith.subf %5, %10 : vector<320x128xf32>
    %12 = tpu.iota {dimensions = array<i32: 1>} : vector<320x128xi32>
    %c96_i32 = arith.constant 96 : i32
    %13 = vector.broadcast %c96_i32 : i32 to vector<320x128xi32>
    %14 = arith.cmpi slt, %12, %13 : vector<320x128xi32>
    %cst_7 = arith.constant 0.000000e+00 : f32
    %15 = vector.broadcast %cst_7 : f32 to vector<320x128xf32>
    %16 = arith.select %14, %11, %15 : vector<320x128xi1>, vector<320x128xf32>
    %17 = arith.mulf %16, %16 : vector<320x128xf32>
    %cst_8 = arith.constant dense<0.000000e+00> : vector<320xf32>
    %18 = vector.multi_reduction <add>, %17, %cst_8 [1] : vector<320x128xf32> to vector<320xf32>
    %19 = vector.shape_cast %18 : vector<320xf32> to vector<320x1xf32>
    %cst_9 = arith.constant 0.010416667 : f32
    %20 = vector.broadcast %cst_9 : f32 to vector<320x1xf32>
    %21 = arith.mulf %19, %20 : vector<320x1xf32>
    %cst_10 = arith.constant 9.99999974E-6 : f32
    %22 = vector.broadcast %cst_10 : f32 to vector<320x1xf32>
    %23 = arith.addf %21, %22 : vector<320x1xf32>
    %24 = math.rsqrt %23 : vector<320x1xf32>
    %25 = vector.broadcast %24 : vector<320x1xf32> to vector<320x128xf32>
    %26 = arith.mulf %16, %25 : vector<320x128xf32>
    %c0_11 = arith.constant 0 : index
    %c0_12 = arith.constant 0 : index
    %27 = vector.load %arg4[%c0_11, %c0_12] : memref<1x128xf32, #tpu.memory_space<vmem>>, vector<1x128xf32>
    %28 = vector.broadcast %27 : vector<1x128xf32> to vector<320x128xf32>
    %29 = arith.mulf %26, %28 : vector<320x128xf32>
    %c0_13 = arith.constant 0 : index
    %c0_14 = arith.constant 0 : index
    %30 = vector.load %arg5[%c0_13, %c0_14] : memref<1x128xf32, #tpu.memory_space<vmem>>, vector<1x128xf32>
    %31 = vector.broadcast %30 : vector<1x128xf32> to vector<320x128xf32>
    %32 = arith.addf %29, %31 : vector<320x128xf32>
    %33 = arith.truncf %32 : vector<320x128xf32> to vector<320x128xbf16>
    %c0_15 = arith.constant 0 : index
    %c0_16 = arith.constant 0 : index
    %34 = vector.load %arg6[%c0_15, %c0_16] : memref<320x128xbf16, #tpu.memory_space<vmem>>, vector<320x128xbf16>
    tpu.vector_store %arg6[%c0_15, %c0_16], %33 {strides = array<i32>} : memref<320x128xbf16, #tpu.memory_space<vmem>>, vector<320x128xbf16>,
    return
  }
  func.func @transform_0(%arg0: i32) -> (i32, i32) {
    %c0_i32 = arith.constant 0 : i32
    %c0_i32_0 = arith.constant 0 : i32
    return %arg0, %c0_i32 : i32, i32
  }
  func.func @transform_1(%arg0: i32) -> (i32, i32) {
    %c0_i32 = arith.constant 0 : i32
    %c0_i32_0 = arith.constant 0 : i32
    %c0_i32_1 = arith.constant 0 : i32
    return %c0_i32, %c0_i32_0 : i32, i32
  }
  func.func @transform_2(%arg0: i32) -> (i32, i32) {
    %c0_i32 = arith.constant 0 : i32
    %c0_i32_0 = arith.constant 0 : i32
    %c0_i32_1 = arith.constant 0 : i32
    return %c0_i32, %c0_i32_0 : i32, i32
  }
  func.func @transform_3(%arg0: i32) -> (i32, i32) {
    %c0_i32 = arith.constant 0 : i32
    %c0_i32_0 = arith.constant 0 : i32
    %c0_i32_1 = arith.constant 0 : i32
    return %c0_i32, %c0_i32_0 : i32, i32
  }
  func.func @transform_4(%arg0: i32) -> (i32, i32) {
    %c0_i32 = arith.constant 0 : i32
    %c0_i32_0 = arith.constant 0 : i32
    %c0_i32_1 = arith.constant 0 : i32
    return %c0_i32, %c0_i32_0 : i32, i32
  }
  func.func @transform_5(%arg0: i32) -> (i32, i32) {
    %c0_i32 = arith.constant 0 : i32
    %c0_i32_0 = arith.constant 0 : i32
    return %arg0, %c0_i32 : i32, i32
  }
}

</mosaic_0001>

<bundles_post_ra>
// kernel: tpu_custom_call.1
= control target key start
LH: loop header
LB: loop body
LE: loop exit
PB: predicated region body
PF: predicated region fallthrough
CT: control target
= control target key end

     0   :  { %10 = vsyncpa [#allocation3], 0  ;;  %s3073_s0 = inlined_call_operand.hbm [shape: bf16[640,128], index: 0, kind: input, shape index: {}]   ;;  %s3074_s1 = inlined_call_operand.hbm [shape: bf16[128,128], index: 1, kind: input, shape index: {}]   ;;  %s3075_s2 = inlined_call_operand.vmem [shape: f32[1,128], index: 2, kind: input, shape index: {}]   ;;  %s3076_s3 = inlined_call_operand.vmem [shape: f32[1,128], index: 3, kind: input, shape index: {}]   ;;  %s3077_s4 = inlined_call_operand.vmem [shape: f32[1,128], index: 4, kind: input, shape index: {}]   ;;  %s3078_s5 = inlined_call_operand.hbm [shape: bf16[640,128], index: 5, kind: output, shape index: {}]  }
   0x1   :  { %12 = vsyncpa [#allocation3 + $0x1], 0 }
   0x2   :  { %13 = vsyncpa [#allocation6], 0 }
   0x3   :  { %14 = vsyncpa [#allocation4], 0 }
   0x4   :  { %16 = vsyncpa [#allocation4 + $0x1], 0  ;;  %s2239_s18 = smov 0   ;;  %s2241_s19 = smov 0  }
   0x5   :  { %s2243_s20 = smov 0   ;;  %s2245_s21 = smov 0  }
   0x6 LB: > { %s2260_s22 = sadd.s32 4294967295, %s2200_s21   ;;  %s1559_s23 = sadd.s32 4294967294, %s2200_s21   ;;  %s2200_s21 = sphi %s2245_s21, %s3100_s21   ;;  %s2196_s20 = sphi %s2243_s20, %s3099_s20   ;;  %s2192_s19 = sphi %s2241_s19, %s3098_s19   ;;  %s2188_s18 = sphi %s2239_s18, %s3097_s18  }
   0x7   : > { %p42_p0 = scmp.ne.s32.totalorder %s2192_s19, %s2188_s18  ;;  %p3079_p1 = scmp.eq.s32.totalorder %s2260_s22, 0 }
   0x8   : > { %p156_p3 = scmp.eq.s32.totalorder %s1559_s23, 1  ;;  %p1560_p5 = scmp.ge.s32.totalorder %s2200_s21, 1 }
   0x9   : > { %p2269_p4 = por %p3079_p1, %p42_p0  ;;  %p163_p7 = scmp.lt.s32.totalorder %s2200_s21, 3 }
   0xa   : > { %p2274_p6 = por %p156_p3, %p42_p0  ;;  %s2202_s27 = smov [#allocation5]  }
   0xb   : > { %s3083_s24 = scalar_select %p2269_p4, 1, 0 }
   0xc   : > { %s3084_s25 = scalar_select %p2274_p6, 1, 0 }
   0xd   : > { %p2279_p8 = pnand %p1560_p5, %p163_p7  ;;  %s175_s28 = sshll.u32 %s2202_s27, 4  ;;  %s2283_s28 = int_to_ptr.vmem [resolvable:$true] %s175_s28 }
   0xe   : > { %s2295_s30 = sadd.s32 1, %s2200_s21   ;;  %s29_s6 = sadd.s32 1, %s2196_s20 }
   0xf   : > { %s3085_s26 = scalar_select %p2279_p8, 1, 0 }
  0x10   : > { %p1911_p9 = pneg %p2279_p8  ;;  %s26_s7 = ssub.s32 %s2200_s21, %s2295_s30 }
  0x11   : > { %s2072_s10 = scalar_lea.hbm %s3074_s1, 1024 }
  0x12   : > { %p2290_p11 = pnand %p1911_p9, %p3079_p1  ;;  %p2073_p12 = scmp.ne.s32.totalorder %s3074_s1, %s2072_s10 }
  0x13   : > { %p2079_p5 = scmp.lt.u32.totalorder %s2072_s10, %s3074_s1 }
  0x14   : > { %p2074_p13 = pneg %p2290_p11 }
  0x16   : > { %p2075_p0 = pnand %p2074_p13, %p2073_p12 }
  0x18   : > { %p2076_p3 = pneg %p2075_p0 }
  0x1a   : > { %p2081_p7 = pnand %p2079_p5, %p2076_p3 }
  0x1c   : > { %2084 = shalt.err (!%p2081_p7)
}
  0x1d   : > { %s2085_s15 = scalar_lea.vmem %s2283_s28, 1024  ;;  %p2093_p2 = scmp.lt.s32.totalorder %s2283_s28, %s2283_s28 }
  0x1e   : > { %p2086_p9 = scmp.ne.s32.totalorder %s2283_s28, %s2085_s15  ;;  %p2094_p6 = scmp.lt.s32.totalorder %s2085_s15, %s2085_s15 }
  0x20   : > { %p2088_p10 = pnand %p2086_p9, %p2074_p13  ;;  %p2095_p4 = por %p2094_p6, %p2093_p2 }
  0x22   : > { %p2089_p1 = pneg %p2088_p10 }
  0x24   : > { %p2096_p8 = pnand %p2095_p4, %p2089_p1 }
  0x26   : > { %2099 = shalt.err (!%p2096_p8)
}
  0x27   : > { %s3082_s16 = smov 64   ;;  %s2204_s17 = smov 4  }
  0x28   : > { %1914 = dma.hbm_to_vmem [thread:$0]  (!%p2290_p11), %s3074_s1, 1024, %s2283_s28, [#allocation6], %s3082_s16, %s3082_s16, %s2204_s17  }
  0x29   : > { %p27_p1 = scmp.eq.s32.totalorder %s26_s7, 0  ;;  %p36_p2 = scmp.ne.s32.totalorder %s2196_s20, %s2192_s19 }
  0x2a   : > { %p37_p4 = scmp.eq.s32.totalorder %s2200_s21, 0  ;;  %p1924_p6 = scmp.lt.s32.totalorder %s2200_s21, 2 }
  0x2b   : > { %s2329_s8 = scalar_select %p27_p1, %s2196_s20, %s29_s6  }
  0x2c   : > { %p38_p8 = por %p37_p4, %p36_p2  ;;  %p3087_p10 = scmp.eq.s32.totalorder %s2260_s22, 1 }
  0x2d   : > { %s198_s29 = sand.u32 1, %s2196_s20   ;;  %s1640_s10 = smul.u32 2560, %s2200_s21 }
  0x2e   : > { %p2333_p12 = por %p3087_p10, %p36_p2  ;;  %s1901_s11 = smul.u32 160, %s198_s29 }
  0x2f   : > { %p2339_p13 = pnand %p1924_p6, %p38_p8  ;;  %s2346_s6 = scalar_lea.hbm %s3073_s0, %s1640_s10 }
  0x30   : > { %s202_s13 = scalar_lea.vmem [#allocation2], %s1901_s11  ;;  %s2350_s15 = scalar_lea.sflag [#allocation3], %s198_s29 }
  0x31   : > { %s209_s14 = sshll.u32 %s202_s13, 4  ;;  %s2100_s23 = scalar_lea.hbm %s2346_s6, 2560  ;;  %s2348_s14 = int_to_ptr.vmem [resolvable:$true] %s209_s14 }
  0x32   : > { %p2101_p11 = scmp.ne.s32.totalorder %s2346_s6, %s2100_s23  ;;  %p2102_p0 = pneg %p2339_p13 }
  0x33   : > { %s2105_s28 = scalar_lea.hbm %s3073_s0, 5120  ;;  %p2106_p7 = scmp.lt.u32.totalorder %s2346_s6, %s3073_s0 }
  0x34   : > { %p2103_p3 = pnand %p2102_p0, %p2101_p11  ;;  %p2107_p9 = scmp.lt.u32.totalorder %s2105_s28, %s2100_s23 }
  0x35   : > { %p2109_p2 = scmp.lt.u32.totalorder %s2100_s23, %s2346_s6 }
  0x36   : > { %p2104_p5 = pneg %p2103_p3  ;;  %p2108_p1 = por %p2107_p9, %p2106_p7 }
  0x38   : > { %p2110_p4 = por %p2109_p2, %p2108_p1 }
  0x3a   : > { %p2111_p6 = pnand %p2110_p4, %p2104_p5 }
  0x3c   : > { %2114 = shalt.err (!%p2111_p6)
}
  0x3d   : > { %s2115_s29 = scalar_lea.vmem %s2348_s14, 2560  ;;  %s2205_s11 = smov [#allocation2]  }
  0x3e   : > { %p2116_p8 = scmp.ne.s32.totalorder %s2348_s14, %s2115_s29  ;;  %s2120_s13 = sshll.u32 %s2205_s11, 4  ;;  %s2121_s13 = int_to_ptr.vmem [resolvable:$false] %s2120_s13 }
  0x3f   : > { %s2122_s16 = scalar_lea.vmem %s2121_s13, 5120  ;;  %p2123_p3 = scmp.lt.s32.totalorder %s2348_s14, %s2121_s13 }
  0x40   : > { %p2118_p10 = pnand %p2116_p8, %p2102_p0  ;;  %p2124_p7 = scmp.lt.s32.totalorder %s2122_s16, %s2115_s29 }
  0x42   : > { %p2119_p11 = pneg %p2118_p10  ;;  %p2125_p9 = por %p2124_p7, %p2123_p3 }
  0x44   : > { %p2126_p1 = pnand %p2125_p9, %p2119_p11 }
  0x46   : > { %2129 = shalt.err (!%p2126_p1)
}
  0x47   : > { %s3090_s23 = smov 64   ;;  %p3091_p0 = scmp.ne.s32.totalorder %s3085_s26, 0 }
  0x48   : > { %1918 = dma.hbm_to_vmem [thread:$0]  (!%p2339_p13), %s2346_s6, 2560, %s2348_s14, %s2350_s15, %s3090_s23, %s3090_s23, %s2204_s17  }
  0x49   : > { %221 = sbr.rel (%p3091_p0) target bundleno = 741 (0x2e5), region = 40  ;;  %s2384_s27 = sand.u32 (!%p3091_p0), 1, %s2192_s19  }
  0x4a   : > { %s1902_s10 = smul.u32 (!%p3091_p0), 160, %s2384_s27  ;;  %s224_s28 = scalar_lea.sflag (!%p3091_p0), [#allocation3], %s2384_s27 }
  0x4b   : > { %p3092_p5 = scmp.ne.s32.totalorder (!%p3091_p0), %s3083_s24, 0 }
  0x4c   : > { %s2390_s12 = scalar_lea.vmem (!%p3091_p0), [#allocation2], %s1902_s10 }
  0x50   : > { %2175 = dma.done.wait (%p3092_p5), %s224_s28, 2560  }
  0x51   : > { %2177 = vsyncadd (%p3092_p5), %s224_s28, 4294964736  ;;  %p3093_p13 = scmp.eq.s32.totalorder %s2260_s22, 0 }
  0x53   : > { %2179 = dma.done.wait (%p3093_p13), [#allocation6], 1024   ;;  %p3094_p2 = pmov %p3093_p13 }
  0x54   : > { %v1964_v0 = vld [vmem:[#allocation5] sm:$0xff]   ;;  %v1965_v1 = vld [vmem:[#allocation5 + $0x8] sm:$0xff]   ;;  %v1966_v2 = vld [vmem:[#allocation5 + $0x10] sm:$0xff]   ;;  %s2892_s7 = scalar_lea.vmem [#allocation7], %s1902_s10  ;;  %s1681_s29 = smul.u32 2560, %s2260_s22 }
  0x55   : > { %2181 = vsyncadd (%p3094_p2), [#allocation6], 4294966272  ;;  %1829 = vmatprep.subr.bf16.mxu0 %v1964_v0  ;;  %1885 = vmatprep.subr.bf16.mxu1 %v1964_v0  ;;  %v1967_v3 = vld [vmem:[#allocation5 + $0x18] sm:$0xff]   ;;  %v1972_v4 = vld [vmem:[%s2390_s12] sm:$0xff]   ;;  %s1476_s11 = sshll.u32 %s2892_s7, 4  ;;  %s1463_s22 = scalar_lea.sflag [#allocation4], %s2384_s27  ;;  %s3028_s11 = int_to_ptr.vmem [resolvable:$true] %s1476_s11 }
  0x56   : > { %1830 = vmatpush3.bf16.msra.mxu0 %v1964_v0  ;;  %1893 = vmatpush3.bf16.msra.mxu1 %v1964_v0  ;;  %v1973_v5 = vld [vmem:[%s2390_s12 + $0x50] sm:$0xff]   ;;  %v1968_v6 = vld [vmem:[#allocation5 + $0x20] sm:$0xff]   ;;  %v1969_v7 = vld [vmem:[#allocation5 + $0x28] sm:$0xff]   ;;  %s3026_s23 = scalar_lea.hbm %s3078_s5, %s1681_s29  ;;  %s2130_s10 = scalar_lea.vmem %s3028_s11, 2560 }
  0x57   : > { %1831 = vmatprep.subr.bf16.mxu0 %v1965_v1  ;;  %1886 = vmatprep.subr.bf16.mxu1 %v1965_v1  ;;  %v1970_v8 = vld [vmem:[#allocation5 + $0x30] sm:$0xff]   ;;  %v1971_v9 = vld [vmem:[#allocation5 + $0x38] sm:$0xff]   ;;  %v1974_v10 = vld [vmem:[%s2390_s12 + $0x8] sm:$0xff]   ;;  %p2131_p4 = scmp.ne.s32.totalorder %s3028_s11, %s2130_s10  ;;  %s2206_s28 = smov [#allocation7]  }
  0x58   : > { %1845 = vmatprep.mubr.bf16.mxu0 %v1972_v4  ;;  %1865 = vmatprep.mubr.bf16.mxu1 %v1973_v5  ;;  %v1975_v11 = vld [vmem:[%s2390_s12 + $0x58] sm:$0xff]   ;;  %v1976_v12 = vld [vmem:[%s2390_s12 + $0x10] sm:$0xff]   ;;  %v1978_v13 = vld [vmem:[%s2390_s12 + $0x60] sm:$0xff]  }
  0x59   : > { %v1977_v14 = vld [vmem:[%s2390_s12 + $0x18] sm:$0xff]   ;;  %v1979_v15 = vld [vmem:[%s2390_s12 + $0x68] sm:$0xff]   ;;  %v1980_v16 = vld [vmem:[%s2390_s12 + $0x20] sm:$0xff]   ;;  %p2132_p6 = pnand %p2131_p4, %p2333_p12 }
  0x5a   : > { %1832 = vmatpush3.bf16.msra.mxu0 %v1965_v1  ;;  %1894 = vmatpush3.bf16.msra.mxu1 %v1965_v1  ;;  %v1982_v17 = vld [vmem:[%s2390_s12 + $0x70] sm:$0xff]   ;;  %v1981_v18 = vld [vmem:[%s2390_s12 + $0x28] sm:$0xff]   ;;  %v1983_v19 = vld [vmem:[%s2390_s12 + $0x78] sm:$0xff]  }
  0x5b   : > { %1833 = vmatprep.subr.bf16.mxu0 %v1966_v2  ;;  %1887 = vmatprep.subr.bf16.mxu1 %v1966_v2  ;;  %v1984_v20 = vld [vmem:[%s2390_s12 + $0x30] sm:$0xff]   ;;  %v1986_v21 = vld [vmem:[%s2390_s12 + $0x80] sm:$0xff]   ;;  %v1985_v22 = vld [vmem:[%s2390_s12 + $0x38] sm:$0xff]   ;;  %p2133_p8 = pneg %p2132_p6 }
  0x5c   : > { %v1987_v23 = vld [vmem:[%s2390_s12 + $0x88] sm:$0xff]   ;;  %v1988_v24 = vld [vmem:[%s2390_s12 + $0x40] sm:$0xff]   ;;  %v1990_v25 = vld [vmem:[%s2390_s12 + $0x90] sm:$0xff]  }
  0x5d   : > { %v1989_v26 = vld [vmem:[%s2390_s12 + $0x48] sm:$0xff]   ;;  %v1991_v27 = vld [vmem:[%s2390_s12 + $0x98] sm:$0xff]   ;;  %v2423_v28 = vld [vmem:[%s3075_s2] ss:$0 sm:$0xff]  ;;  %s2134_s12 = sshll.u32 %s2206_s28, 4  ;;  %s2135_s12 = int_to_ptr.vmem [resolvable:$false] %s2134_s12 }
  0x5e   : > { %1834 = vmatpush3.bf16.msra.mxu0 %v1966_v2  ;;  %1895 = vmatpush3.bf16.msra.mxu1 %v1966_v2  ;;  %s2136_s24 = scalar_lea.vmem %s2135_s12, 5120  ;;  %p2137_p10 = scmp.lt.s32.totalorder %s3028_s11, %s2135_s12 }
  0x5f   : > { %1835 = vmatprep.subr.bf16.mxu0 %v1967_v3  ;;  %1888 = vmatprep.subr.bf16.mxu1 %v1967_v3  ;;  %p2138_p11 = scmp.lt.s32.totalorder %s2136_s24, %s2130_s10 }
  0x61   : > { %p2139_p3 = por %p2138_p11, %p2137_p10 }
  0x62   : > { %1836 = vmatpush3.bf16.msra.mxu0 %v1967_v3  ;;  %1896 = vmatpush3.bf16.msra.mxu1 %v1967_v3 }
  0x63   : > { %1837 = vmatprep.subr.bf16.mxu0 %v1968_v6  ;;  %1889 = vmatprep.subr.bf16.mxu1 %v1968_v6  ;;  %p2140_p7 = pnand %p2139_p3, %p2133_p8 }
  0x66   : > { %1838 = vmatpush3.bf16.msra.mxu0 %v1968_v6  ;;  %1897 = vmatpush3.bf16.msra.mxu1 %v1968_v6 }
  0x67   : > { %1839 = vmatprep.subr.bf16.mxu0 %v1969_v7  ;;  %1890 = vmatprep.subr.bf16.mxu1 %v1969_v7 }
  0x6a   : > { %1840 = vmatpush3.bf16.msra.mxu0 %v1969_v7  ;;  %1898 = vmatpush3.bf16.msra.mxu1 %v1969_v7 }
  0x6b   : > { %1841 = vmatprep.subr.bf16.mxu0 %v1970_v8  ;;  %1891 = vmatprep.subr.bf16.mxu1 %v1970_v8 }
  0x6e   : > { %1842 = vmatpush3.bf16.msra.mxu0 %v1970_v8  ;;  %1899 = vmatpush3.bf16.msra.mxu1 %v1970_v8 }
  0x6f   : > { %1843 = vmatprep.subr.bf16.mxu0 %v1971_v9  ;;  %1892 = vmatprep.subr.bf16.mxu1 %v1971_v9 }
  0x72   : > { %1844 = vmatpush3.bf16.msra.mxu0 %v1971_v9  ;;  %1900 = vmatpush3.bf16.msra.mxu1 %v1971_v9 }
  0x75   : > { %1846 = vmatmul.mubr.bf16.vlgmr.msra.gmra.mrb[0].mxu0 %v1974_v10  ;;  %1866 = vmatmul.mubr.bf16.vlgmr.msra.gmra.mrb[0].mxu1 %v1975_v11 }
  0x76   : > { %1849 = vmatprep.mubr.bf16.mxu0 %v1976_v12  ;;  %1869 = vmatprep.mubr.bf16.mxu1 %v1978_v13 }
  0x7d   : > { %1850 = vmatmul.mubr.bf16.gmra.mrb[4].mxu0 %v1977_v14  ;;  %1870 = vmatmul.mubr.bf16.gmra.mrb[4].mxu1 %v1979_v15 }
  0x7e   : > { %1853 = vmatprep.mubr.bf16.mxu0 %v1980_v16  ;;  %1873 = vmatprep.mubr.bf16.mxu1 %v1982_v17 }
  0x85   : > { %1854 = vmatmul.mubr.bf16.gmra.mrb[8].mxu0 %v1981_v18  ;;  %1874 = vmatmul.mubr.bf16.gmra.mrb[8].mxu1 %v1983_v19 }
  0x86   : > { %1857 = vmatprep.mubr.bf16.mxu0 %v1984_v20  ;;  %1877 = vmatprep.mubr.bf16.mxu1 %v1986_v21 }
  0x8d   : > { %1858 = vmatmul.mubr.bf16.gmra.mrb[12].mxu0 %v1985_v22  ;;  %1878 = vmatmul.mubr.bf16.gmra.mrb[12].mxu1 %v1987_v23 }
  0x8e   : > { %1861 = vmatprep.mubr.bf16.mxu0 %v1988_v24  ;;  %1881 = vmatprep.mubr.bf16.mxu1 %v1990_v25 }
  0x95   : > { %1862 = vmatmul.mubr.bf16.gmra.mrb[16].mxu0 %v1989_v26  ;;  %1882 = vmatmul.mubr.bf16.gmra.mrb[16].mxu1 %v1991_v27 }
 0x148   : > { %v1847_v29 = vpop.f32.mrb[0].mxu0  ;;  %v1867_v30 = vpop.f32.mrb[0].mxu1 }
 0x149   : > { %v2426_v31 = vadd.f32 %v1847_v29, %v2423_v28  ;;  %v2429_v32 = vadd.f32 %v1867_v30, %v2423_v28  ;;  %v526_v33 = vpop.f32.mrb[1].mxu0  ;;  %v606_v34 = vpop.f32.mrb[1].mxu1 }
 0x14a   : > { %v1848_v35 = vpop.f32.mrb[2].mxu0  ;;  %v1868_v36 = vpop.f32.mrb[2].mxu1  ;;  %v2434_v39 = vadd.f32 %v2423_v28, %v526_v33  ;;  %v2442_v43 = vadd.f32 %v2423_v28, %v606_v34 }
 0x14b   : > { %729 = vadd.xlane.f32.xlu0 %v2429_v32  ;;  %v609_v37 = vpop.f32.mrb[3].mxu1  ;;  %689 = vadd.xlane.f32.xlu1 %v2426_v31  ;;  %v529_v38 = vpop.f32.mrb[3].mxu0  ;;  %v2437_v40 = vadd.f32 %v1848_v35, %v2423_v28  ;;  %v2445_v44 = vadd.f32 %v1868_v36, %v2423_v28 }
 0x14c   : > { %v2450_v51 = vadd.f32 %v2423_v28, %v609_v37  ;;  %v2453_v52 = vadd.f32 %v2423_v28, %v529_v38 }
 0x14f   : > { %691 = vadd.xlane.f32.xlu1 %v2437_v40  ;;  %685 = vadd.xlane.f32.xlu0 %v2434_v39 }
 0x150   : > { %v1851_v41 = vpop.f32.mrb[4].mxu0  ;;  %v1871_v42 = vpop.f32.mrb[4].mxu1 }
 0x151   : > { %v542_v45 = vpop.f32.mrb[5].mxu0  ;;  %v622_v46 = vpop.f32.mrb[5].mxu1  ;;  %v2458_v55 = vadd.f32 %v1851_v41, %v2423_v28  ;;  %v2466_v63 = vadd.f32 %v1871_v42, %v2423_v28 }
 0x152   : > { %v1852_v47 = vpop.f32.mrb[6].mxu0  ;;  %v1872_v48 = vpop.f32.mrb[6].mxu1  ;;  %v2474_v3 = vadd.f32 %v2423_v28, %v542_v45  ;;  %v2482_v11 = vadd.f32 %v2423_v28, %v622_v46 }
 0x153   : > { %731 = vadd.xlane.f32.xlu1 %v2445_v44  ;;  %725 = vadd.xlane.f32.xlu0 %v2442_v43  ;;  %v545_v49 = vpop.f32.mrb[7].mxu0  ;;  %v625_v50 = vpop.f32.mrb[7].mxu1  ;;  %v2461_v56 = vadd.f32 %v1852_v47, %v2423_v28  ;;  %v2469_v0 = vadd.f32 %v1872_v48, %v2423_v28 }
 0x154   : > { %v2477_v4 = vadd.f32 %v2423_v28, %v545_v49  ;;  %v2485_v12 = vadd.f32 %v2423_v28, %v625_v50 }
 0x157   : > { %727 = vadd.xlane.f32.xlu1 %v2450_v51  ;;  %687 = vadd.xlane.f32.xlu0 %v2453_v52 }
 0x158   : > { %v1855_v53 = vpop.f32.mrb[8].mxu0  ;;  %v1875_v54 = vpop.f32.mrb[8].mxu1 }
 0x159   : > { %v558_v57 = vpop.f32.mrb[9].mxu0  ;;  %v638_v58 = vpop.f32.mrb[9].mxu1  ;;  %v2490_v15 = vadd.f32 %v1855_v53, %v2423_v28  ;;  %v2522_v34 = vadd.f32 %v1875_v54, %v2423_v28 }
 0x15a   : > { %v1856_v59 = vpop.f32.mrb[10].mxu0  ;;  %v1876_v60 = vpop.f32.mrb[10].mxu1  ;;  %v2530_v36 = vadd.f32 %v2423_v28, %v558_v57  ;;  %v2538_v38 = vadd.f32 %v2423_v28, %v638_v58 }
 0x15b   : > { %699 = vadd.xlane.f32.xlu1 %v2461_v56  ;;  %697 = vadd.xlane.f32.xlu0 %v2458_v55  ;;  %v561_v61 = vpop.f32.mrb[11].mxu0  ;;  %v641_v62 = vpop.f32.mrb[11].mxu1  ;;  %v2493_v16 = vadd.f32 %v1856_v59, %v2423_v28  ;;  %v2525_v35 = vadd.f32 %v1876_v60, %v2423_v28 }
 0x15c   : > { %v2533_v37 = vadd.f32 %v2423_v28, %v561_v61  ;;  %v2541_v41 = vadd.f32 %v2423_v28, %v641_v62 }
 0x15f   : > { %739 = vadd.xlane.f32.xlu1 %v2469_v0  ;;  %737 = vadd.xlane.f32.xlu0 %v2466_v63 }
 0x160   : > { %v1859_v1 = vpop.f32.mrb[12].mxu0  ;;  %v1879_v2 = vpop.f32.mrb[12].mxu1 }
 0x161   : > { %v574_v5 = vpop.f32.mrb[13].mxu0  ;;  %v654_v6 = vpop.f32.mrb[13].mxu1  ;;  %v2546_v42 = vadd.f32 %v1859_v1, %v2423_v28  ;;  %v2554_v46 = vadd.f32 %v1879_v2, %v2423_v28 }
 0x162   : > { %v1860_v7 = vpop.f32.mrb[14].mxu0  ;;  %v1880_v8 = vpop.f32.mrb[14].mxu1  ;;  %v2562_v48 = vadd.f32 %v2423_v28, %v574_v5  ;;  %v2570_v50 = vadd.f32 %v2423_v28, %v654_v6 }
 0x163   : > { %695 = vadd.xlane.f32.xlu1 %v2477_v4  ;;  %693 = vadd.xlane.f32.xlu0 %v2474_v3  ;;  %v577_v9 = vpop.f32.mrb[15].mxu0  ;;  %v657_v10 = vpop.f32.mrb[15].mxu1  ;;  %v2549_v45 = vadd.f32 %v1860_v7, %v2423_v28  ;;  %v2557_v47 = vadd.f32 %v1880_v8, %v2423_v28 }
 0x164   : > { %v2565_v49 = vadd.f32 %v2423_v28, %v577_v9  ;;  %v2573_v53 = vadd.f32 %v2423_v28, %v657_v10 }
 0x167   : > { %735 = vadd.xlane.f32.xlu1 %v2485_v12  ;;  %733 = vadd.xlane.f32.xlu0 %v2482_v11 }
 0x168   : > { %v1863_v13 = vpop.f32.mrb[16].mxu0  ;;  %v1883_v14 = vpop.f32.mrb[16].mxu1 }
 0x169   : > { %v2496_v17 = vadd.f32 %v1863_v13, %v2423_v28  ;;  %v590_v18 = vpop.f32.mrb[17].mxu0  ;;  %v2499_v19 = vadd.f32 %v1883_v14, %v2423_v28  ;;  %v670_v20 = vpop.f32.mrb[17].mxu1 }
 0x16a   : > { %v2502_v21 = vadd.f32 %v2423_v28, %v590_v18  ;;  %v1864_v22 = vpop.f32.mrb[18].mxu0  ;;  %v2505_v23 = vadd.f32 %v2423_v28, %v670_v20  ;;  %v1884_v24 = vpop.f32.mrb[18].mxu1 }
 0x16b   : > { %707 = vadd.xlane.f32.xlu1 %v2493_v16  ;;  %705 = vadd.xlane.f32.xlu0 %v2490_v15  ;;  %v2510_v25 = vadd.f32 %v1864_v22, %v2423_v28  ;;  %v593_v26 = vpop.f32.mrb[19].mxu0  ;;  %v2513_v27 = vadd.f32 %v1884_v24, %v2423_v28  ;;  %v673_v29 = vpop.f32.mrb[19].mxu1 }
 0x16c   : > { %v2516_v30 = vadd.f32 %v2423_v28, %v593_v26  ;;  %v2519_v33 = vadd.f32 %v2423_v28, %v673_v29  ;;  %v845_v28 = vlaneseq }
 0x16e   : > { %v2585_v54 = vand.u32 127, %v845_v28 }
 0x16f   : > { %747 = vadd.xlane.f32.xlu1 %v2525_v35  ;;  %745 = vadd.xlane.f32.xlu0 %v2522_v34 }
 0x170   : > { %vm847_vm0 = vcmp.lt.s32.totalorder %v2585_v54, 96 }
 0x173   : > { %703 = vadd.xlane.f32.xlu1 %v2533_v37  ;;  %701 = vadd.xlane.f32.xlu0 %v2530_v36 }
 0x177   : > { %743 = vadd.xlane.f32.xlu1 %v2541_v41  ;;  %741 = vadd.xlane.f32.xlu0 %v2538_v38 }
 0x17b   : > { %715 = vadd.xlane.f32.xlu1 %v2549_v45  ;;  %713 = vadd.xlane.f32.xlu0 %v2546_v42 }
 0x17f   : > { %755 = vadd.xlane.f32.xlu1 %v2557_v47  ;;  %753 = vadd.xlane.f32.xlu0 %v2554_v46 }
 0x183   : > { %711 = vadd.xlane.f32.xlu1 %v2565_v49  ;;  %709 = vadd.xlane.f32.xlu0 %v2562_v48 }
 0x187   : > { %751 = vadd.xlane.f32.xlu1 %v2573_v53  ;;  %749 = vadd.xlane.f32.xlu0 %v2570_v50 }
 0x18b   : > { %723 = vadd.xlane.f32.xlu1 %v2510_v25  ;;  %721 = vadd.xlane.f32.xlu0 %v2496_v17 }
 0x18f   : > { %763 = vadd.xlane.f32.xlu1 %v2513_v27  ;;  %761 = vadd.xlane.f32.xlu0 %v2499_v19 }
 0x193   : > { %719 = vadd.xlane.f32.xlu1 %v2516_v30  ;;  %717 = vadd.xlane.f32.xlu0 %v2502_v21 }
 0x197   : > { %759 = vadd.xlane.f32.xlu1 %v2519_v33  ;;  %757 = vadd.xlane.f32.xlu0 %v2505_v23 }
 0x1d8   : > { %v730_v57 = vpop.xlane.xlu0 %729  ;;  %v690_v58 = vpop.xlane.xlu1 %689 }
 0x1d9   : > { %v787_v59 = vmul.f32 0.010416667, %v730_v57  ;;  %v767_v60 = vmul.f32 0.010416667, %v690_v58 }
 0x1db   : > { %v827_v61 = vsub.f32 %v2429_v32, %v787_v59  ;;  %v807_v62 = vsub.f32 %v2426_v31, %v767_v60 }
 0x1dc   : > { %v692_v1 = vpop.xlane.xlu1 %691  ;;  %v686_v2 = vpop.xlane.xlu0 %685 }
 0x1dd   : > { %v768_v5 = vmul.f32 0.010416667, %v692_v1  ;;  %v765_v6 = vmul.f32 0.010416667, %v686_v2  ;;  %v2592_v7 = vsel %vm847_vm0, %v807_v62, 0.0  ;;  %v2600_v32 = vsel %vm847_vm0, %v827_v61, 0.0 }
 0x1de   : > { %v890_v8 = vmul.f32 %v2592_v7, %v2592_v7 }
 0x1df   : > { %v808_v9 = vsub.f32 %v2437_v40, %v768_v5  ;;  %v805_v10 = vsub.f32 %v2434_v39, %v765_v6  ;;  %v910_v40 = vmul.f32 %v2600_v32, %v2600_v32 }
 0x1e0   : > { %v732_v31 = vpop.xlane.xlu1 %731  ;;  %932 = vadd.xlane.f32.xlu0 %v890_v8  ;;  %v726_v13 = vpop.xlane.xlu0 %725 }
 0x1e1   : > { %v788_v14 = vmul.f32 0.010416667, %v732_v31  ;;  %v785_v18 = vmul.f32 0.010416667, %v726_v13  ;;  %v2604_v20 = vsel %vm847_vm0, %v808_v9, 0.0  ;;  %v2614_v26 = vsel %vm847_vm0, %v805_v10, 0.0 }
 0x1e2   : > { %v891_v22 = vmul.f32 %v2604_v20, %v2604_v20 }
 0x1e3   : > { %v828_v39 = vsub.f32 %v2445_v44, %v788_v14  ;;  %v825_v24 = vsub.f32 %v2442_v43, %v785_v18  ;;  %v888_v43 = vmul.f32 %v2614_v26, %v2614_v26 }
 0x1e4   : > { %v728_v29 = vpop.xlane.xlu1 %727  ;;  %934 = vadd.xlane.f32.xlu1 %v891_v22  ;;  %972 = vadd.xlane.f32.xlu0 %v910_v40  ;;  %v688_v28 = vpop.xlane.xlu0 %687 }
 0x1e5   : > { %v786_v57 = vmul.f32 0.010416667, %v728_v29  ;;  %v766_v58 = vmul.f32 0.010416667, %v688_v28  ;;  %v2618_v59 = vsel %vm847_vm0, %v828_v39, 0.0  ;;  %v2628_v62 = vsel %vm847_vm0, %v825_v24, 0.0 }
 0x1e6   : > { %v911_v60 = vmul.f32 %v2618_v59, %v2618_v59  ;;  %v908_v9 = vmul.f32 %v2628_v62, %v2628_v62 }
 0x1e7   : > { %v826_v44 = vsub.f32 %v2450_v51, %v786_v57  ;;  %v806_v61 = vsub.f32 %v2453_v52, %v766_v58 }
 0x1e8   : > { %v700_v1 = vpop.xlane.xlu1 %699  ;;  %974 = vadd.xlane.f32.xlu1 %v911_v60  ;;  %928 = vadd.xlane.f32.xlu0 %v888_v43  ;;  %v698_v2 = vpop.xlane.xlu0 %697 }
 0x1e9   : > { %v772_v5 = vmul.f32 0.010416667, %v700_v1  ;;  %v771_v6 = vmul.f32 0.010416667, %v698_v2  ;;  %v2632_v8 = vsel %vm847_vm0, %v806_v61, 0.0  ;;  %v2642_v31 = vsel %vm847_vm0, %v826_v44, 0.0 }
 0x1ea   : > { %v889_v51 = vmul.f32 %v2632_v8, %v2632_v8  ;;  %v909_v39 = vmul.f32 %v2642_v31, %v2642_v31 }
 0x1eb   : > { %v812_v52 = vsub.f32 %v2461_v56, %v772_v5  ;;  %v811_v10 = vsub.f32 %v2458_v55, %v771_v6 }
 0x1ec   : > { %v740_v13 = vpop.xlane.xlu1 %739  ;;  %968 = vadd.xlane.f32.xlu0 %v908_v9  ;;  %930 = vadd.xlane.f32.xlu1 %v889_v51  ;;  %v738_v14 = vpop.xlane.xlu0 %737 }
 0x1ed   : > { %v792_v18 = vmul.f32 0.010416667, %v740_v13  ;;  %v791_v22 = vmul.f32 0.010416667, %v738_v14  ;;  %v2646_v40 = vsel %vm847_vm0, %v811_v10, 0.0  ;;  %v2656_v29 = vsel %vm847_vm0, %v812_v52, 0.0 }
 0x1ee   : > { %v894_v55 = vmul.f32 %v2646_v40, %v2646_v40  ;;  %v895_v44 = vmul.f32 %v2656_v29, %v2656_v29 }
 0x1ef   : > { %v832_v56 = vsub.f32 %v2469_v0, %v792_v18  ;;  %v831_v24 = vsub.f32 %v2466_v63, %v791_v22 }
 0x1f0   : > { %v696_v28 = vpop.xlane.xlu1 %695  ;;  %970 = vadd.xlane.f32.xlu1 %v909_v39  ;;  %940 = vadd.xlane.f32.xlu0 %v894_v55  ;;  %v694_v57 = vpop.xlane.xlu0 %693 }
 0x1f1   : > { %v770_v58 = vmul.f32 0.010416667, %v696_v28  ;;  %v769_v60 = vmul.f32 0.010416667, %v694_v57  ;;  %v2660_v43 = vsel %vm847_vm0, %v831_v24, 0.0  ;;  %v2670_v1 = vsel %vm847_vm0, %v832_v56, 0.0 }
 0x1f2   : > { %v914_v63 = vmul.f32 %v2660_v43, %v2660_v43  ;;  %v915_v52 = vmul.f32 %v2670_v1, %v2670_v1 }
 0x1f3   : > { %v810_v0 = vsub.f32 %v2477_v4, %v770_v58  ;;  %v809_v61 = vsub.f32 %v2474_v3, %v769_v60 }
 0x1f4   : > { %v736_v2 = vpop.xlane.xlu1 %735  ;;  %942 = vadd.xlane.f32.xlu1 %v895_v44  ;;  %980 = vadd.xlane.f32.xlu0 %v914_v63  ;;  %v734_v5 = vpop.xlane.xlu0 %733 }
 0x1f5   : > { %v790_v6 = vmul.f32 0.010416667, %v736_v2  ;;  %v789_v9 = vmul.f32 0.010416667, %v734_v5  ;;  %v2674_v51 = vsel %vm847_vm0, %v809_v61, 0.0  ;;  %v2684_v13 = vsel %vm847_vm0, %v810_v0, 0.0 }
 0x1f6   : > { %v892_v3 = vmul.f32 %v2674_v51, %v2674_v51  ;;  %v893_v56 = vmul.f32 %v2684_v13, %v2684_v13 }
 0x1f7   : > { %v830_v4 = vsub.f32 %v2485_v12, %v790_v6  ;;  %v829_v10 = vsub.f32 %v2482_v11, %v789_v9 }
 0x1f8   : > { %v708_v14 = vpop.xlane.xlu1 %707  ;;  %982 = vadd.xlane.f32.xlu1 %v915_v52  ;;  %936 = vadd.xlane.f32.xlu0 %v892_v3  ;;  %v706_v18 = vpop.xlane.xlu0 %705 }
 0x1f9   : > { %v776_v22 = vmul.f32 0.010416667, %v708_v14  ;;  %v775_v39 = vmul.f32 0.010416667, %v706_v18  ;;  %v2688_v55 = vsel %vm847_vm0, %v829_v10, 0.0  ;;  %v2698_v28 = vsel %vm847_vm0, %v830_v4, 0.0 }
 0x1fa   : > { %v912_v11 = vmul.f32 %v2688_v55, %v2688_v55  ;;  %v913_v0 = vmul.f32 %v2698_v28, %v2698_v28 }
 0x1fb   : > { %v816_v12 = vsub.f32 %v2493_v16, %v776_v22  ;;  %v815_v24 = vsub.f32 %v2490_v15, %v775_v39 }
 0x1fc   : > { %v748_v57 = vpop.xlane.xlu1 %747  ;;  %938 = vadd.xlane.f32.xlu1 %v893_v56  ;;  %976 = vadd.xlane.f32.xlu0 %v912_v11  ;;  %v746_v58 = vpop.xlane.xlu0 %745 }
 0x1fd   : > { %v796_v60 = vmul.f32 0.010416667, %v748_v57  ;;  %v795_v44 = vmul.f32 0.010416667, %v746_v58  ;;  %v2702_v63 = vsel %vm847_vm0, %v815_v24, 0.0  ;;  %v2712_v2 = vsel %vm847_vm0, %v816_v12, 0.0 }
 0x1fe   : > { %v898_v15 = vmul.f32 %v2702_v63, %v2702_v63  ;;  %v899_v4 = vmul.f32 %v2712_v2, %v2712_v2 }
 0x1ff   : > { %v836_v16 = vsub.f32 %v2525_v35, %v796_v60  ;;  %v835_v61 = vsub.f32 %v2522_v34, %v795_v44 }
 0x200   : > { %v704_v5 = vpop.xlane.xlu1 %703  ;;  %978 = vadd.xlane.f32.xlu1 %v913_v0  ;;  %948 = vadd.xlane.f32.xlu0 %v898_v15  ;;  %v702_v6 = vpop.xlane.xlu0 %701 }
 0x201   : > { %v774_v9 = vmul.f32 0.010416667, %v704_v5  ;;  %v773_v52 = vmul.f32 0.010416667, %v702_v6  ;;  %v2716_v3 = vsel %vm847_vm0, %v835_v61, 0.0  ;;  %v2726_v14 = vsel %vm847_vm0, %v836_v16, 0.0 }
 0x202   : > { %v918_v34 = vmul.f32 %v2716_v3, %v2716_v3  ;;  %v919_v12 = vmul.f32 %v2726_v14, %v2726_v14 }
 0x203   : > { %v814_v35 = vsub.f32 %v2533_v37, %v774_v9  ;;  %v813_v10 = vsub.f32 %v2530_v36, %v773_v52 }
 0x204   : > { %v744_v18 = vpop.xlane.xlu1 %743  ;;  %950 = vadd.xlane.f32.xlu1 %v899_v4  ;;  %988 = vadd.xlane.f32.xlu0 %v918_v34  ;;  %v742_v22 = vpop.xlane.xlu0 %741 }
 0x205   : > { %v794_v39 = vmul.f32 0.010416667, %v744_v18  ;;  %v793_v56 = vmul.f32 0.010416667, %v742_v22  ;;  %v2730_v11 = vsel %vm847_vm0, %v813_v10, 0.0  ;;  %v2740_v57 = vsel %vm847_vm0, %v814_v35, 0.0 }
 0x206   : > { %v896_v36 = vmul.f32 %v2730_v11, %v2730_v11  ;;  %v897_v16 = vmul.f32 %v2740_v57, %v2740_v57 }
 0x207   : > { %v834_v37 = vsub.f32 %v2541_v41, %v794_v39  ;;  %v833_v24 = vsub.f32 %v2538_v38, %v793_v56 }
 0x208   : > { %v716_v58 = vpop.xlane.xlu1 %715  ;;  %990 = vadd.xlane.f32.xlu1 %v919_v12  ;;  %944 = vadd.xlane.f32.xlu0 %v896_v36  ;;  %v714_v60 = vpop.xlane.xlu0 %713 }
 0x209   : > { %v780_v44 = vmul.f32 0.010416667, %v716_v58  ;;  %v779_v0 = vmul.f32 0.010416667, %v714_v60  ;;  %v2744_v15 = vsel %vm847_vm0, %v833_v24, 0.0  ;;  %v2754_v5 = vsel %vm847_vm0, %v834_v37, 0.0 }
 0x20a   : > { %v916_v38 = vmul.f32 %v2744_v15, %v2744_v15  ;;  %v917_v35 = vmul.f32 %v2754_v5, %v2754_v5 }
 0x20b   : > { %v820_v41 = vsub.f32 %v2549_v45, %v780_v44  ;;  %v819_v61 = vsub.f32 %v2546_v42, %v779_v0 }
 0x20c   : > { %v756_v6 = vpop.xlane.xlu1 %755  ;;  %946 = vadd.xlane.f32.xlu1 %v897_v16  ;;  %984 = vadd.xlane.f32.xlu0 %v916_v38  ;;  %v754_v9 = vpop.xlane.xlu0 %753 }
 0x20d   : > { %v800_v52 = vmul.f32 0.010416667, %v756_v6  ;;  %v799_v4 = vmul.f32 0.010416667, %v754_v9  ;;  %v2758_v34 = vsel %vm847_vm0, %v819_v61, 0.0  ;;  %v2768_v18 = vsel %vm847_vm0, %v820_v41, 0.0 }
 0x20e   : > { %v902_v42 = vmul.f32 %v2758_v34, %v2758_v34  ;;  %v903_v37 = vmul.f32 %v2768_v18, %v2768_v18 }
 0x20f   : > { %v840_v45 = vsub.f32 %v2557_v47, %v800_v52  ;;  %v839_v10 = vsub.f32 %v2554_v46, %v799_v4 }
 0x210   : > { %v712_v22 = vpop.xlane.xlu1 %711  ;;  %986 = vadd.xlane.f32.xlu1 %v917_v35  ;;  %956 = vadd.xlane.f32.xlu0 %v902_v42  ;;  %v710_v39 = vpop.xlane.xlu0 %709 }
 0x211   : > { %v778_v56 = vmul.f32 0.010416667, %v712_v22  ;;  %v777_v12 = vmul.f32 0.010416667, %v710_v39  ;;  %v2772_v36 = vsel %vm847_vm0, %v839_v10, 0.0  ;;  %v2782_v58 = vsel %vm847_vm0, %v840_v45, 0.0 }
 0x212   : > { %v922_v46 = vmul.f32 %v2772_v36, %v2772_v36  ;;  %v923_v41 = vmul.f32 %v2782_v58, %v2782_v58 }
 0x213   : > { %v818_v47 = vsub.f32 %v2565_v49, %v778_v56  ;;  %v817_v24 = vsub.f32 %v2562_v48, %v777_v12 }
 0x214   : > { %v752_v60 = vpop.xlane.xlu1 %751  ;;  %958 = vadd.xlane.f32.xlu1 %v903_v37  ;;  %996 = vadd.xlane.f32.xlu0 %v922_v46  ;;  %v750_v44 = vpop.xlane.xlu0 %749 }
 0x215   : > { %v798_v0 = vmul.f32 0.010416667, %v752_v60  ;;  %v797_v16 = vmul.f32 0.010416667, %v750_v44  ;;  %v2786_v38 = vsel %vm847_vm0, %v817_v24, 0.0  ;;  %v2796_v6 = vsel %vm847_vm0, %v818_v47, 0.0 }
 0x216   : > { %v900_v48 = vmul.f32 %v2786_v38, %v2786_v38  ;;  %v901_v45 = vmul.f32 %v2796_v6, %v2796_v6 }
 0x217   : > { %v838_v49 = vsub.f32 %v2573_v53, %v798_v0  ;;  %v837_v61 = vsub.f32 %v2570_v50, %v797_v16 }
 0x218   : > { %v724_v9 = vpop.xlane.xlu1 %723  ;;  %998 = vadd.xlane.f32.xlu1 %v923_v41  ;;  %952 = vadd.xlane.f32.xlu0 %v900_v48  ;;  %v722_v52 = vpop.xlane.xlu0 %721 }
 0x219   : > { %v784_v4 = vmul.f32 0.010416667, %v724_v9  ;;  %v783_v35 = vmul.f32 0.010416667, %v722_v52  ;;  %v2800_v42 = vsel %vm847_vm0, %v837_v61, 0.0  ;;  %v2810_v22 = vsel %vm847_vm0, %v838_v49, 0.0 }
 0x21a   : > { %v920_v50 = vmul.f32 %v2800_v42, %v2800_v42  ;;  %v921_v37 = vmul.f32 %v2810_v22, %v2810_v22 }
 0x21b   : > { %v824_v53 = vsub.f32 %v2510_v25, %v784_v4  ;;  %v823_v10 = vsub.f32 %v2496_v17, %v783_v35 }
 0x21c   : > { %v764_v39 = vpop.xlane.xlu1 %763  ;;  %954 = vadd.xlane.f32.xlu1 %v901_v45  ;;  %992 = vadd.xlane.f32.xlu0 %v920_v50  ;;  %v762_v56 = vpop.xlane.xlu0 %761 }
 0x21d   : > { %v2814_v12 = vsel %vm847_vm0, %v823_v10, 0.0  ;;  %v2822_v17 = vsel %vm847_vm0, %v824_v53, 0.0  ;;  %v804_v0 = vmul.f32 0.010416667, %v764_v39  ;;  %v803_v16 = vmul.f32 0.010416667, %v762_v56 }
 0x21e   : > { %v906_v25 = vmul.f32 %v2814_v12, %v2814_v12  ;;  %v907_v44 = vmul.f32 %v2822_v17, %v2822_v17 }
 0x21f   : > { %v843_v50 = vsub.f32 %v2499_v19, %v803_v16 }
 0x220   : > { %v720_v46 = vpop.xlane.xlu1 %719  ;;  %994 = vadd.xlane.f32.xlu1 %v921_v37  ;;  %964 = vadd.xlane.f32.xlu0 %v906_v25  ;;  %v718_v47 = vpop.xlane.xlu0 %717 }
 0x221   : > { %v782_v24 = vmul.f32 0.010416667, %v720_v46  ;;  %v781_v60 = vmul.f32 0.010416667, %v718_v47 }
 0x223   : > { %v822_v41 = vsub.f32 %v2516_v30, %v782_v24  ;;  %v821_v48 = vsub.f32 %v2502_v21, %v781_v60  ;;  %v844_v21 = vsub.f32 %v2513_v27, %v804_v0 }
 0x224   : > { %v760_v49 = vpop.xlane.xlu1 %759  ;;  %966 = vadd.xlane.f32.xlu1 %v907_v44  ;;  %v758_v61 = vpop.xlane.xlu0 %757 }
 0x225   : > { %v802_v9 = vmul.f32 0.010416667, %v760_v49  ;;  %v801_v52 = vmul.f32 0.010416667, %v758_v61  ;;  %v2830_v4 = vsel %vm847_vm0, %v822_v41, 0.0  ;;  %v2834_v35 = vsel %vm847_vm0, %v821_v48, 0.0 }
 0x226   : > { %v905_v45 = vmul.f32 %v2830_v4, %v2830_v4  ;;  %v904_v30 = vmul.f32 %v2834_v35, %v2834_v35  ;;  %v2858_v27 = vsel %vm847_vm0, %v844_v21, 0.0 }
 0x227   : > { %v842_v53 = vsub.f32 %v2519_v33, %v802_v9  ;;  %v841_v10 = vsub.f32 %v2505_v23, %v801_v52  ;;  %v2862_v23 = vsel %vm847_vm0, %v843_v50, 0.0  ;;  %v927_v33 = vmul.f32 %v2858_v27, %v2858_v27 }
 0x228   : > { %962 = vadd.xlane.f32.xlu1 %v905_v45  ;;  %960 = vadd.xlane.f32.xlu0 %v904_v30  ;;  %v926_v25 = vmul.f32 %v2862_v23, %v2862_v23 }
 0x229   : > { %v2846_v39 = vsel %vm847_vm0, %v842_v53, 0.0  ;;  %v2850_v56 = vsel %vm847_vm0, %v841_v10, 0.0 }
 0x22a   : > { %v925_v37 = vmul.f32 %v2846_v39, %v2846_v39  ;;  %v924_v19 = vmul.f32 %v2850_v56, %v2850_v56 }
 0x22c   : > { %1002 = vadd.xlane.f32.xlu1 %v925_v37  ;;  %1000 = vadd.xlane.f32.xlu0 %v924_v19 }
 0x230   : > { %1006 = vadd.xlane.f32.xlu1 %v927_v33  ;;  %1004 = vadd.xlane.f32.xlu0 %v926_v25 }
 0x26d   : > { %v933_v46 = vpop.xlane.xlu0 %932 }
 0x26e   : > { %v1010_v47 = vmul.f32 0.010416667, %v933_v46 }
 0x270   : > { %v1050_v24 = vadd.f32 1e-05, %v1010_v47  ;;  %v2872_v47 = vld [vmem:[%s3076_s3] ss:$0 sm:$0xff] }
 0x271   : > { %v935_v60 = vpop.xlane.xlu1 %934  ;;  %v973_v44 = vpop.xlane.xlu0 %972 }
 0x272   : > { %1992 = vrsqrt.f32 %v1050_v24  ;;  %v1011_v0 = vmul.f32 0.010416667, %v935_v60  ;;  %v1030_v54 = vmul.f32 0.010416667, %v973_v44 }
 0x274   : > { %v1051_v16 = vadd.f32 1e-05, %v1011_v0  ;;  %v1070_v41 = vadd.f32 1e-05, %v1030_v54 }
 0x275   : > { %v975_v48 = vpop.xlane.xlu1 %974  ;;  %v929_v49 = vpop.xlane.xlu0 %928 }
 0x276   : > { %1994 = vrsqrt.f32 %v1051_v16  ;;  %v1031_v61 = vmul.f32 0.010416667, %v975_v48  ;;  %v1008_v9 = vmul.f32 0.010416667, %v929_v49 }
 0x277   : > { %1996 = vrsqrt.f32 %v1070_v41 }
 0x278   : > { %v1071_v52 = vadd.f32 1e-05, %v1031_v61  ;;  %v1048_v45 = vadd.f32 1e-05, %v1008_v9  ;;  %v2879_v61 = vld [vmem:[%s3077_s4] ss:$0 sm:$0xff] }
 0x279   : > { %v931_v30 = vpop.xlane.xlu1 %930  ;;  %v969_v21 = vpop.xlane.xlu0 %968 }
 0x27a   : > { %1998 = vrsqrt.f32 %v1071_v52  ;;  %v1009_v50 = vmul.f32 0.010416667, %v931_v30  ;;  %v1028_v53 = vmul.f32 0.010416667, %v969_v21 }
 0x27b   : > { %2000 = vrsqrt.f32 %v1048_v45 }
 0x27c   : > { %v1993_v10 = vpop.eup %1992  ;;  %v1049_v37 = vadd.f32 1e-05, %v1009_v50  ;;  %v1068_v19 = vadd.f32 1e-05, %v1028_v53 }
 0x27d   : > { %v1130_v33 = vmul.f32 %v1993_v10, %v2592_v7  ;;  %v971_v25 = vpop.xlane.xlu1 %970  ;;  %v941_v46 = vpop.xlane.xlu0 %940 }
 0x27e   : > { %2002 = vrsqrt.f32 %v1049_v37  ;;  %v1029_v24 = vmul.f32 0.010416667, %v971_v25  ;;  %v1014_v60 = vmul.f32 0.010416667, %v941_v46 }
 0x27f   : > { %2004 = vrsqrt.f32 %v1068_v19  ;;  %v1177_v41 = vmul.f32 %v2872_v47, %v1130_v33 }
 0x280   : > { %v1995_v44 = vpop.eup %1994  ;;  %v1069_v0 = vadd.f32 1e-05, %v1029_v24  ;;  %v1054_v54 = vadd.f32 1e-05, %v1014_v60 }
 0x281   : > { %v1997_v16 = vpop.eup %1996  ;;  %v1131_v48 = vmul.f32 %v1995_v44, %v2604_v20  ;;  %v943_v7 = vpop.xlane.xlu1 %942  ;;  %v1224_v37 = vadd.f32 %v2879_v61, %v1177_v41 }
 0x282   : > { %v981_v49 = vpop.xlane.xlu0 %980  ;;  %v1150_v9 = vmul.f32 %v1997_v16, %v2600_v32  ;;  %2006 = vrsqrt.f32 %v1069_v0  ;;  %v1015_v52 = vmul.f32 0.010416667, %v943_v7 }
 0x283   : > { %v1034_v45 = vmul.f32 0.010416667, %v981_v49  ;;  %v1178_v30 = vmul.f32 %v2872_v47, %v1131_v48  ;;  %2008 = vrsqrt.f32 %v1054_v54 }
 0x284   : > { %v1999_v21 = vpop.eup %1998  ;;  %v1197_v50 = vmul.f32 %v2872_v47, %v1150_v9  ;;  %v1055_v53 = vadd.f32 1e-05, %v1015_v52 }
 0x285   : > { %v1074_v20 = vadd.f32 1e-05, %v1034_v45  ;;  %v2001_v10 = vpop.eup %2000  ;;  %v1225_v19 = vadd.f32 %v2879_v61, %v1178_v30  ;;  %v1151_v33 = vmul.f32 %v1999_v21, %v2618_v59  ;;  %v983_v32 = vpop.xlane.xlu1 %982 }
 0x286   : > { %v937_v25 = vpop.xlane.xlu0 %936  ;;  %v1128_v46 = vmul.f32 %v2001_v10, %v2614_v26  ;;  %2010 = vrsqrt.f32 %v1055_v53  ;;  %v1035_v24 = vmul.f32 0.010416667, %v983_v32  ;;  %v1244_v16 = vadd.f32 %v2879_v61, %v1197_v50 }
 0x287   : > { %v1690_v60 = vpack.c.bf16 %v1225_v19, %v1224_v37  ;;  %v1198_v44 = vmul.f32 %v2872_v47, %v1151_v33  ;;  %2012 = vrsqrt.f32 %v1074_v20  ;;  %v1012_v0 = vmul.f32 0.010416667, %v937_v25 }
 0x288   : > { %v2003_v54 = vpop.eup %2002  ;;  %v1075_v41 = vadd.f32 1e-05, %v1035_v24  ;;  %v1175_v26 = vmul.f32 %v2872_v47, %v1128_v46 }
 0x289   : > { %v2005_v48 = vpop.eup %2004  ;;  %1782 = vst [vmem:[%s2892_s7 + $0x8] sm:$0xff] %v1690_v60   ;;  %v1245_v59 = vadd.f32 %v2879_v61, %v1198_v44  ;;  %v1129_v7 = vmul.f32 %v2003_v54, %v2632_v8  ;;  %v1052_v49 = vadd.f32 1e-05, %v1012_v0  ;;  %v939_v9 = vpop.xlane.xlu1 %938 }
 0x28a   : > { %v977_v52 = vpop.xlane.xlu0 %976  ;;  %v1148_v45 = vmul.f32 %v2005_v48, %v2628_v62  ;;  %2014 = vrsqrt.f32 %v1075_v41  ;;  %v1013_v30 = vmul.f32 0.010416667, %v939_v9  ;;  %v1222_v8 = vadd.f32 %v2879_v61, %v1175_v26 }
 0x28b   : > { %v1740_v21 = vpack.c.bf16 %v1245_v59, %v1244_v16  ;;  %v1176_v50 = vmul.f32 %v2872_v47, %v1129_v7  ;;  %2016 = vrsqrt.f32 %v1052_v49  ;;  %v1032_v53 = vmul.f32 0.010416667, %v977_v52 }
 0x28c   : > { %v2007_v20 = vpop.eup %2006  ;;  %v1195_v10 = vmul.f32 %v2872_v47, %v1148_v45  ;;  %v1053_v37 = vadd.f32 1e-05, %v1013_v30 }
 0x28d   : > { %v2009_v19 = vpop.eup %2008  ;;  %1792 = vst [vmem:[%s2892_s7 + $0x58] sm:$0xff] %v1740_v21   ;;  %v1223_v33 = vadd.f32 %v2879_v61, %v1176_v50  ;;  %v1149_v62 = vmul.f32 %v2007_v20, %v2642_v31  ;;  %v1072_v32 = vadd.f32 1e-05, %v1032_v53  ;;  %v979_v25 = vpop.xlane.xlu1 %978 }
 0x28e   : > { %v949_v46 = vpop.xlane.xlu0 %948  ;;  %v1134_v24 = vmul.f32 %v2009_v19, %v2646_v40  ;;  %2018 = vrsqrt.f32 %v1053_v37  ;;  %v1033_v60 = vmul.f32 0.010416667, %v979_v25  ;;  %v1242_v41 = vadd.f32 %v2879_v61, %v1195_v10 }
 0x28f   : > { %v1685_v44 = vpack.c.bf16 %v1223_v33, %v1222_v8  ;;  %v1196_v0 = vmul.f32 %v2872_v47, %v1149_v62  ;;  %2020 = vrsqrt.f32 %v1072_v32  ;;  %v1018_v54 = vmul.f32 0.010416667, %v949_v46 }
 0x290   : > { %v2011_v16 = vpop.eup %2010  ;;  %v1073_v48 = vadd.f32 1e-05, %v1033_v60  ;;  %v1181_v26 = vmul.f32 %v2872_v47, %v1134_v24 }
 0x291   : > { %v2013_v59 = vpop.eup %2012  ;;  %1686 = vst [vmem:[%s2892_s7] sm:$0xff] %v1685_v44   ;;  %v1243_v31 = vadd.f32 %v2879_v61, %v1196_v0  ;;  %v1135_v40 = vmul.f32 %v2011_v16, %v2656_v29  ;;  %v1058_v7 = vadd.f32 1e-05, %v1018_v54  ;;  %v951_v49 = vpop.xlane.xlu1 %950 }
 0x292   : > { %v989_v9 = vpop.xlane.xlu0 %988  ;;  %v1154_v52 = vmul.f32 %v2013_v59, %v2660_v43  ;;  %2022 = vrsqrt.f32 %v1073_v48  ;;  %v1019_v45 = vmul.f32 0.010416667, %v951_v49  ;;  %v1228_v29 = vadd.f32 %v2879_v61, %v1181_v26 }
 0x293   : > { %v1735_v30 = vpack.c.bf16 %v1243_v31, %v1242_v41  ;;  %v1182_v21 = vmul.f32 %v2872_v47, %v1135_v40  ;;  %2024 = vrsqrt.f32 %v1058_v7  ;;  %v1038_v50 = vmul.f32 0.010416667, %v989_v9 }
 0x294   : > { %v2015_v53 = vpop.eup %2014  ;;  %v1201_v20 = vmul.f32 %v2872_v47, %v1154_v52  ;;  %v1059_v10 = vadd.f32 1e-05, %v1019_v45 }
 0x295   : > { %v2017_v37 = vpop.eup %2016  ;;  %1791 = vst [vmem:[%s2892_s7 + $0x50] sm:$0xff] %v1735_v30   ;;  %v1229_v19 = vadd.f32 %v2879_v61, %v1182_v21  ;;  %v1155_v43 = vmul.f32 %v2015_v53, %v2670_v1  ;;  %v1078_v8 = vadd.f32 1e-05, %v1038_v50  ;;  %v991_v33 = vpop.xlane.xlu1 %990 }
 0x296   : > { %v945_v62 = vpop.xlane.xlu0 %944  ;;  %v1132_v32 = vmul.f32 %v2017_v37, %v2674_v51  ;;  %2026 = vrsqrt.f32 %v1059_v10  ;;  %v1039_v25 = vmul.f32 0.010416667, %v991_v33  ;;  %v1248_v0 = vadd.f32 %v2879_v61, %v1201_v20 }
 0x297   : > { %v1700_v46 = vpack.c.bf16 %v1229_v19, %v1228_v29  ;;  %v1202_v24 = vmul.f32 %v2872_v47, %v1155_v43  ;;  %2028 = vrsqrt.f32 %v1078_v8  ;;  %v1016_v60 = vmul.f32 0.010416667, %v945_v62 }
 0x298   : > { %v2019_v44 = vpop.eup %2018  ;;  %v1079_v54 = vadd.f32 1e-05, %v1039_v25  ;;  %v1179_v41 = vmul.f32 %v2872_v47, %v1132_v32 }
 0x299   : > { %v2021_v16 = vpop.eup %2020  ;;  %1784 = vst [vmem:[%s2892_s7 + $0x18] sm:$0xff] %v1700_v46   ;;  %v1249_v1 = vadd.f32 %v2879_v61, %v1202_v24  ;;  %v1133_v51 = vmul.f32 %v2019_v44, %v2684_v13  ;;  %v1056_v48 = vadd.f32 1e-05, %v1016_v60  ;;  %v947_v59 = vpop.xlane.xlu1 %946 }
 0x29a   : > { %v985_v31 = vpop.xlane.xlu0 %984  ;;  %v1152_v26 = vmul.f32 %v2021_v16, %v2688_v55  ;;  %2030 = vrsqrt.f32 %v1079_v54  ;;  %v1017_v40 = vmul.f32 0.010416667, %v947_v59  ;;  %v1226_v13 = vadd.f32 %v2879_v61, %v1179_v41 }
 0x29b   : > { %v1750_v7 = vpack.c.bf16 %v1249_v1, %v1248_v0  ;;  %v1180_v49 = vmul.f32 %v2872_v47, %v1133_v51  ;;  %2032 = vrsqrt.f32 %v1056_v48  ;;  %v1036_v9 = vmul.f32 0.010416667, %v985_v31 }
 0x29c   : > { %v2023_v52 = vpop.eup %2022  ;;  %v1199_v45 = vmul.f32 %v2872_v47, %v1152_v26  ;;  %v1057_v30 = vadd.f32 1e-05, %v1017_v40 }
 0x29d   : > { %v2025_v21 = vpop.eup %2024  ;;  %1794 = vst [vmem:[%s2892_s7 + $0x68] sm:$0xff] %v1750_v7   ;;  %v1227_v50 = vadd.f32 %v2879_v61, %v1180_v49  ;;  %v1153_v55 = vmul.f32 %v2023_v52, %v2698_v28  ;;  %v1076_v53 = vadd.f32 1e-05, %v1036_v9  ;;  %v987_v20 = vpop.xlane.xlu1 %986 }
 0x29e   : > { %v957_v10 = vpop.xlane.xlu0 %956  ;;  %v1138_v37 = vmul.f32 %v2025_v21, %v2702_v63  ;;  %2034 = vrsqrt.f32 %v1057_v30  ;;  %v1037_v29 = vmul.f32 0.010416667, %v987_v20  ;;  %v1246_v62 = vadd.f32 %v2879_v61, %v1199_v45 }
 0x29f   : > { %v1695_v19 = vpack.c.bf16 %v1227_v50, %v1226_v13  ;;  %v1200_v43 = vmul.f32 %v2872_v47, %v1153_v55  ;;  %2036 = vrsqrt.f32 %v1076_v53  ;;  %v1022_v8 = vmul.f32 0.010416667, %v957_v10 }
 0x2a0   : > { %v2027_v33 = vpop.eup %2026  ;;  %v1077_v32 = vadd.f32 1e-05, %v1037_v29  ;;  %v1185_v46 = vmul.f32 %v2872_v47, %v1138_v37 }
 0x2a1   : > { %v2029_v25 = vpop.eup %2028  ;;  %1783 = vst [vmem:[%s2892_s7 + $0x10] sm:$0xff] %v1695_v19   ;;  %v1247_v28 = vadd.f32 %v2879_v61, %v1200_v43  ;;  %v1139_v63 = vmul.f32 %v2027_v33, %v2712_v2  ;;  %v1062_v24 = vadd.f32 1e-05, %v1022_v8  ;;  %v959_v60 = vpop.xlane.xlu1 %958 }
 0x2a2   : > { %v997_v44 = vpop.xlane.xlu0 %996  ;;  %v1158_v0 = vmul.f32 %v2029_v25, %v2716_v3  ;;  %2038 = vrsqrt.f32 %v1077_v32  ;;  %v1023_v54 = vmul.f32 0.010416667, %v959_v60  ;;  %v1232_v2 = vadd.f32 %v2879_v61, %v1185_v46 }
 0x2a3   : > { %v1745_v16 = vpack.c.bf16 %v1247_v28, %v1246_v62  ;;  %v1186_v1 = vmul.f32 %v2872_v47, %v1139_v63  ;;  %2040 = vrsqrt.f32 %v1062_v24  ;;  %v1042_v41 = vmul.f32 0.010416667, %v997_v44 }
 0x2a4   : > { %v2031_v51 = vpop.eup %2030  ;;  %v1205_v48 = vmul.f32 %v2872_v47, %v1158_v0  ;;  %v1063_v59 = vadd.f32 1e-05, %v1023_v54 }
 0x2a5   : > { %v2033_v31 = vpop.eup %2032  ;;  %1793 = vst [vmem:[%s2892_s7 + $0x60] sm:$0xff] %v1745_v16   ;;  %v1233_v26 = vadd.f32 %v2879_v61, %v1186_v1  ;;  %v1159_v3 = vmul.f32 %v2031_v51, %v2726_v14  ;;  %v1082_v40 = vadd.f32 1e-05, %v1042_v41  ;;  %v999_v7 = vpop.xlane.xlu1 %998 }
 0x2a6   : > { %v953_v49 = vpop.xlane.xlu0 %952  ;;  %v1136_v9 = vmul.f32 %v2033_v31, %v2730_v11  ;;  %2042 = vrsqrt.f32 %v1063_v59  ;;  %v1043_v52 = vmul.f32 0.010416667, %v999_v7  ;;  %v1252_v50 = vadd.f32 %v2879_v61, %v1205_v48 }
 0x2a7   : > { %v1710_v45 = vpack.c.bf16 %v1233_v26, %v1232_v2  ;;  %v1206_v30 = vmul.f32 %v2872_v47, %v1159_v3  ;;  %2044 = vrsqrt.f32 %v1082_v40  ;;  %v1020_v21 = vmul.f32 0.010416667, %v953_v49 }
 0x2a8   : > { %v2035_v13 = vpop.eup %2034  ;;  %v1083_v55 = vadd.f32 1e-05, %v1043_v52  ;;  %v1183_v20 = vmul.f32 %v2872_v47, %v1136_v9 }
 0x2a9   : > { %v2037_v53 = vpop.eup %2036  ;;  %1786 = vst [vmem:[%s2892_s7 + $0x28] sm:$0xff] %v1710_v45   ;;  %v1253_v14 = vadd.f32 %v2879_v61, %v1206_v30  ;;  %v1137_v11 = vmul.f32 %v2035_v13, %v2740_v57  ;;  %v1060_v10 = vadd.f32 1e-05, %v1020_v21  ;;  %v955_v37 = vpop.xlane.xlu1 %954 }
 0x2aa   : > { %v993_v29 = vpop.xlane.xlu0 %992  ;;  %v1156_v19 = vmul.f32 %v2037_v53, %v2744_v15  ;;  %2046 = vrsqrt.f32 %v1083_v55  ;;  %v1021_v43 = vmul.f32 0.010416667, %v955_v37  ;;  %v1230_v57 = vadd.f32 %v2879_v61, %v1183_v20 }
 0x2ab   : > { %v1760_v8 = vpack.c.bf16 %v1253_v14, %v1252_v50  ;;  %v1184_v33 = vmul.f32 %v2872_v47, %v1137_v11  ;;  %2048 = vrsqrt.f32 %v1060_v10  ;;  %v1040_v62 = vmul.f32 0.010416667, %v993_v29 }
 0x2ac   : > { %v2039_v32 = vpop.eup %2038  ;;  %v1203_v25 = vmul.f32 %v2872_v47, %v1156_v19  ;;  %v1061_v28 = vadd.f32 1e-05, %v1021_v43 }
 0x2ad   : > { %v2041_v46 = vpop.eup %2040  ;;  %1796 = vst [vmem:[%s2892_s7 + $0x78] sm:$0xff] %v1760_v8   ;;  %v1231_v63 = vadd.f32 %v2879_v61, %v1184_v33  ;;  %v1157_v15 = vmul.f32 %v2039_v32, %v2754_v5  ;;  %v1080_v24 = vadd.f32 1e-05, %v1040_v62  ;;  %v995_v60 = vpop.xlane.xlu1 %994 }
 0x2ae   : > { %v965_v44 = vpop.xlane.xlu0 %964  ;;  %v1142_v0 = vmul.f32 %v2041_v46, %v2758_v34  ;;  %2050 = vrsqrt.f32 %v1061_v28  ;;  %v1041_v54 = vmul.f32 0.010416667, %v995_v60  ;;  %v1250_v48 = vadd.f32 %v2879_v61, %v1203_v25 }
 0x2af   : > { %v1705_v16 = vpack.c.bf16 %v1231_v63, %v1230_v57  ;;  %v1204_v1 = vmul.f32 %v2872_v47, %v1157_v15  ;;  %2052 = vrsqrt.f32 %v1080_v24  ;;  %v1026_v41 = vmul.f32 0.010416667, %v965_v44 }
 0x2b0   : > { %v2043_v51 = vpop.eup %2042  ;;  %v1081_v59 = vadd.f32 1e-05, %v1041_v54  ;;  %v1189_v2 = vmul.f32 %v2872_v47, %v1142_v0 }
 0x2b1   : > { %v2045_v31 = vpop.eup %2044  ;;  %1785 = vst [vmem:[%s2892_s7 + $0x20] sm:$0xff] %v1705_v16   ;;  %v1251_v5 = vadd.f32 %v2879_v61, %v1204_v1  ;;  %v1143_v34 = vmul.f32 %v2043_v51, %v2768_v18  ;;  %v1066_v26 = vadd.f32 1e-05, %v1026_v41  ;;  %v967_v3 = vpop.xlane.xlu1 %966 }
 0x2b2   : > { %v1162_v40 = vmul.f32 %v2045_v31, %v2772_v36  ;;  %2054 = vrsqrt.f32 %v1081_v59  ;;  %v1027_v7 = vmul.f32 0.010416667, %v967_v3  ;;  %v1236_v13 = vadd.f32 %v2879_v61, %v1189_v2 }
 0x2b3   : > { %v1755_v49 = vpack.c.bf16 %v1251_v5, %v1250_v48  ;;  %v1190_v9 = vmul.f32 %v2872_v47, %v1143_v34  ;;  %2056 = vrsqrt.f32 %v1066_v26 }
 0x2b4   : > { %v2047_v52 = vpop.eup %2046  ;;  %v1209_v45 = vmul.f32 %v2872_v47, %v1162_v40  ;;  %v1067_v30 = vadd.f32 1e-05, %v1027_v7 }
 0x2b5   : > { %v2049_v21 = vpop.eup %2048  ;;  %1795 = vst [vmem:[%s2892_s7 + $0x70] sm:$0xff] %v1755_v49   ;;  %v1237_v18 = vadd.f32 %v2879_v61, %v1190_v9  ;;  %v1163_v50 = vmul.f32 %v2047_v52, %v2782_v58  ;;  %v963_v36 = vpop.xlane.xlu1 %962 }
 0x2b6   : > { %v961_v55 = vpop.xlane.xlu0 %960  ;;  %v1140_v53 = vmul.f32 %v2049_v21, %v2786_v38  ;;  %2058 = vrsqrt.f32 %v1067_v30  ;;  %v1025_v14 = vmul.f32 0.010416667, %v963_v36  ;;  %v1256_v29 = vadd.f32 %v2879_v61, %v1209_v45 }
 0x2b7   : > { %v1720_v20 = vpack.c.bf16 %v1237_v18, %v1236_v13  ;;  %v1210_v11 = vmul.f32 %v2872_v47, %v1163_v50  ;;  %v1024_v10 = vmul.f32 0.010416667, %v961_v55 }
 0x2b8   : > { %v2051_v37 = vpop.eup %2050  ;;  %v1065_v19 = vadd.f32 1e-05, %v1025_v14  ;;  %v1187_v58 = vmul.f32 %v2872_v47, %v1140_v53 }
 0x2b9   : > { %v2053_v43 = vpop.eup %2052  ;;  %1788 = vst [vmem:[%s2892_s7 + $0x38] sm:$0xff] %v1720_v20   ;;  %v1257_v8 = vadd.f32 %v2879_v61, %v1210_v11  ;;  %v1141_v33 = vmul.f32 %v2051_v37, %v2796_v6  ;;  %v1064_v38 = vadd.f32 1e-05, %v1024_v10  ;;  %v1003_v62 = vpop.xlane.xlu1 %1002 }
 0x2ba   : > { %v1001_v32 = vpop.xlane.xlu0 %1000  ;;  %v1160_v25 = vmul.f32 %v2053_v43, %v2800_v42  ;;  %2060 = vrsqrt.f32 %v1065_v19  ;;  %v1045_v28 = vmul.f32 0.010416667, %v1003_v62  ;;  %v1234_v6 = vadd.f32 %v2879_v61, %v1187_v58 }
 0x2bb   : > { %v1770_v46 = vpack.c.bf16 %v1257_v8, %v1256_v29  ;;  %v1188_v57 = vmul.f32 %v2872_v47, %v1141_v33  ;;  %2062 = vrsqrt.f32 %v1064_v38  ;;  %v1044_v63 = vmul.f32 0.010416667, %v1001_v32 }
 0x2bc   : > { %v2055_v15 = vpop.eup %2054  ;;  %v1207_v24 = vmul.f32 %v2872_v47, %v1160_v25  ;;  %v1085_v60 = vadd.f32 1e-05, %v1045_v28 }
 0x2bd   : > { %v2057_v44 = vpop.eup %2056  ;;  %1798 = vst [vmem:[%s2892_s7 + $0x88] sm:$0xff] %v1770_v46   ;;  %v1235_v0 = vadd.f32 %v2879_v61, %v1188_v57  ;;  %v1161_v42 = vmul.f32 %v2055_v15, %v2810_v22  ;;  %v1084_v54 = vadd.f32 1e-05, %v1044_v63  ;;  %v1007_v16 = vpop.xlane.xlu1 %1006 }
 0x2be   : > { %v1005_v1 = vpop.xlane.xlu0 %1004  ;;  %v1146_v41 = vmul.f32 %v2057_v44, %v2814_v12  ;;  %2064 = vrsqrt.f32 %v1085_v60  ;;  %v1047_v51 = vmul.f32 0.010416667, %v1007_v16  ;;  %v1254_v2 = vadd.f32 %v2879_v61, %v1207_v24 }
 0x2bf   : > { %v1715_v48 = vpack.c.bf16 %v1235_v0, %v1234_v6  ;;  %v1208_v59 = vmul.f32 %v2872_v47, %v1161_v42  ;;  %2066 = vrsqrt.f32 %v1084_v54  ;;  %v1046_v31 = vmul.f32 0.010416667, %v1005_v1 }
 0x2c0   : > { %v2059_v5 = vpop.eup %2058  ;;  %v1087_v34 = vadd.f32 1e-05, %v1047_v51  ;;  %v1193_v26 = vmul.f32 %v2872_v47, %v1146_v41 }
 0x2c1   : > { %1787 = vst [vmem:[%s2892_s7 + $0x30] sm:$0xff] %v1715_v48   ;;  %v1255_v22 = vadd.f32 %v2879_v61, %v1208_v59  ;;  %v1147_v3 = vmul.f32 %v2059_v5, %v2822_v17  ;;  %v1086_v12 = vadd.f32 1e-05, %v1046_v31 }
 0x2c2   : > { %2068 = vrsqrt.f32 %v1087_v34  ;;  %v1240_v52 = vadd.f32 %v2879_v61, %v1193_v26 }
 0x2c3   : > { %v1765_v40 = vpack.c.bf16 %v1255_v22, %v1254_v2  ;;  %v1194_v7 = vmul.f32 %v2872_v47, %v1147_v3  ;;  %2070 = vrsqrt.f32 %v1086_v12 }
 0x2c4   : > { %v2061_v49 = vpop.eup %2060 }
 0x2c5   : > { %v2063_v9 = vpop.eup %2062  ;;  %1797 = vst [vmem:[%s2892_s7 + $0x80] sm:$0xff] %v1765_v40   ;;  %v1241_v45 = vadd.f32 %v2879_v61, %v1194_v7  ;;  %v1145_v30 = vmul.f32 %v2061_v49, %v2830_v4 }
 0x2c6   : > { %v1144_v21 = vmul.f32 %v2063_v9, %v2834_v35 }
 0x2c7   : > { %v1730_v13 = vpack.c.bf16 %v1241_v45, %v1240_v52  ;;  %v1192_v17 = vmul.f32 %v2872_v47, %v1145_v30 }
 0x2c8   : > { %v2065_v18 = vpop.eup %2064  ;;  %v1191_v50 = vmul.f32 %v2872_v47, %v1144_v21 }
 0x2c9   : > { %v2067_v36 = vpop.eup %2066  ;;  %1790 = vst [vmem:[%s2892_s7 + $0x48] sm:$0xff] %v1730_v13   ;;  %v1239_v55 = vadd.f32 %v2879_v61, %v1192_v17  ;;  %v1165_v53 = vmul.f32 %v2065_v18, %v2846_v39 }
 0x2ca   : > { %v1238_v14 = vadd.f32 %v2879_v61, %v1191_v50  ;;  %v1164_v4 = vmul.f32 %v2067_v36, %v2850_v56 }
 0x2cb   : > { %v1212_v35 = vmul.f32 %v2872_v47, %v1165_v53 }
 0x2cc   : > { %v2069_v20 = vpop.eup %2068  ;;  %v1725_v11 = vpack.c.bf16 %v1239_v55, %v1238_v14  ;;  %v1211_v10 = vmul.f32 %v2872_v47, %v1164_v4 }
 0x2cd   : > { %v2071_v37 = vpop.eup %2070  ;;  %v1259_v29 = vadd.f32 %v2879_v61, %v1212_v35  ;;  %v1167_v19 = vmul.f32 %v2069_v20, %v2858_v27 }
 0x2ce   : > { %1789 = vst [vmem:[%s2892_s7 + $0x40] sm:$0xff] %v1725_v11   ;;  %v1258_v39 = vadd.f32 %v2879_v61, %v1211_v10  ;;  %v1166_v43 = vmul.f32 %v2071_v37, %v2862_v23 }
 0x2cf   : > { %v1214_v56 = vmul.f32 %v2872_v47, %v1167_v19 }
 0x2d0   : > { %v1775_v8 = vpack.c.bf16 %v1259_v29, %v1258_v39  ;;  %v1213_v58 = vmul.f32 %v2872_v47, %v1166_v43 }
 0x2d1   : > { %v1261_v33 = vadd.f32 %v2879_v61, %v1214_v56 }
 0x2d2   : > { %1799 = vst [vmem:[%s2892_s7 + $0x90] sm:$0xff] %v1775_v8   ;;  %v1260_v38 = vadd.f32 %v2879_v61, %v1213_v58 }
 0x2d4   : > { %v1780_v27 = vpack.c.bf16 %v1261_v33, %v1260_v38 }
 0x2d6   : > { %1800 = vst [vmem:[%s2892_s7 + $0x98] sm:$0xff] %v1780_v27  }
 0x2d7   : > { %2143 = shalt.err (!%p2140_p7)
}
 0x2d8   : > { %s2144_s26 = scalar_lea.hbm %s3026_s23, 2560  ;;  %s2148_s14 = scalar_lea.hbm %s3078_s5, 5120 }
 0x2d9   : > { %p2145_p9 = scmp.ne.s32.totalorder %s3026_s23, %s2144_s26  ;;  %p2149_p5 = scmp.lt.u32.totalorder %s3026_s23, %s3078_s5 }
 0x2da   : > { %p2150_p13 = scmp.lt.u32.totalorder %s2148_s14, %s2144_s26  ;;  %p2152_p4 = scmp.lt.u32.totalorder %s2144_s26, %s3026_s23 }
 0x2db   : > { %p2146_p1 = pnand %p2145_p9, %p2333_p12 }
 0x2dc   : > { %p2151_p2 = por %p2150_p13, %p2149_p5 }
 0x2dd   : > { %p2147_p0 = pneg %p2146_p1 }
 0x2de   : > { %p2153_p6 = por %p2152_p4, %p2151_p2 }
 0x2e0   : > { %p2154_p8 = pnand %p2153_p6, %p2147_p0 }
 0x2e2   : > { %2157 = shalt.err (!%p2154_p8)
}
 0x2e3   : > { %s2207_s29 = smov 64   ;;  %s2208_s13 = smov 4  }
 0x2e4   : > { %1909 = dma.vmem_to_hbm [thread:$0]  (%p2333_p12), %s3028_s11, 2560, %s3026_s23, %s1463_s22, %s2207_s29, %s2207_s29, %s2208_s13  }
 0x2e5 PF: > { %s1491_s16 = sand.u32 1, %s2188_s18   ;;  %p3095_p10 = scmp.ne.s32.totalorder %s3084_s25, 0 }
 0x2e6   : > { %p3096_p11 = scmp.ge.s32.totalorder %s2200_s21, 2  ;;  %s1492_s10 = scalar_lea.sflag [#allocation4], %s1491_s16 }
 0x2e8   : > { %p1920_p3 = pnand %p3096_p11, %p3095_p10 }
 0x2ea   : > { %2183 = dma.done.wait (!%p1920_p3), %s1492_s10, 2560  }
 0x2eb   : > { %2185 = vsyncadd (!%p1920_p3), %s1492_s10, 4294964736  ;;  %p19_p7 = scmp.ge.s32.totalorder %s2295_s30, 4   ;;  %s3097_s18 = smov %s2192_s19 }
 0x2ec   : > { %s3098_s19 = smov %s2196_s20  ;;  %s3099_s20 = smov %s2329_s8 }
 0x2ed   : > { %s3100_s21 = smov %s2295_s30  ;;  %21 = sbr.rel (!%p19_p7) target bundleno = 6 (0x6), region = 89 }
 0x2f4   :  { %1497 = vsyncpa [#allocation3], 1 }
 0x2f5   :  { %1499 = vsyncpa [#allocation3 + $0x1], 1 }
 0x2f6   :  { %1500 = vsyncpa [#allocation6], 1 }
 0x2f7   :  { %1501 = vsyncpa [#allocation4], 1 }
 0x2f8   :  { %1503 = vsyncpa [#allocation4 + $0x1], 1 }

</bundles_post_ra>
